<compile_context>
chip_gen: v6e
topology: v6e:2x2x1
jax: 0.10.0
libtpu: 0.0.40
codegen_flags: <defaults>
</compile_context>

<pallas_src>
import functools
import math

import jax
import jax.numpy as jnp
from jax.experimental import pallas as pl
from jax.experimental.pallas import tpu as pltpu


def _layernorm(x, gamma, beta, eps):
    mu = jnp.mean(x, axis=-1, keepdims=True)
    var = jnp.mean((x - mu) ** 2, axis=-1, keepdims=True)
    return (x - mu) * jax.lax.rsqrt(var + eps) * gamma + beta


def _gelu_exact(x):
    # torch.nn.functional.gelu default (approximate='none'): 0.5*x*(1+erf(x/sqrt(2)))
    return 0.5 * x * (1.0 + jax.lax.erf(x * (1.0 / math.sqrt(2.0))))


def _block_kernel(
    x_ref,
    g1_ref, b1_ref,                      # attention_norm gamma/beta (1, E)
    wqkv_ref, bqkv_ref,                  # fused QKV: (E, 3E) [compute dtype], (1, 3E) f32
    wo_ref, bo_ref,                      # attention output projection
    g2_ref, b2_ref,                      # ffn_norm gamma/beta (1, E)
    wf1_ref, bf1_ref, wf2_ref, bf2_ref,  # mlp linears
    out_ref,
    *rest,
    num_heads, head_dim, eps, compute_dtype, approx_recip, mlp_chunk, emit_probs,
):
    if emit_probs:
        attw_ref, ctx_ref = rest
    else:
        (ctx_ref,) = rest
        attw_ref = None

    Bt, S, E = x_ref.shape
    R = Bt * S
    md = compute_dtype

    x = x_ref[...].astype(jnp.float32).reshape(R, E)      # residual input (R, E)

    # ---- attention_norm + fused QKV projection (one wide MXU op) ----
    x1 = _layernorm(x, g1_ref[...], b1_ref[...], eps)
    qkv = jnp.dot(x1.astype(md), wqkv_ref[...],
                  preferred_element_type=jnp.float32) + bqkv_ref[...]      # (R, 3E) f32
    qkv3 = qkv.reshape(Bt, S, 3 * E)

    # ---- multi-head attention; per-head ctx written into a (Bt,S,E) scratch ----
    scale = 1.0 / math.sqrt(head_dim)
    for h in range(num_heads):                       # static, small H
        q_h = qkv3[:, :, h * head_dim:(h + 1) * head_dim]                  # (Bt, S, Dh)
        k_h = qkv3[:, :, E + h * head_dim:E + (h + 1) * head_dim]
        v_h = qkv3[:, :, 2 * E + h * head_dim:2 * E + (h + 1) * head_dim]

        s = jnp.einsum("bqd,bkd->bqk", q_h.astype(md), k_h.astype(md),
                       preferred_element_type=jnp.float32) * scale         # (Bt, S, S)
        s = s - jnp.max(s, axis=-1, keepdims=True)
        p = jnp.exp(s)
        denom = jnp.sum(p, axis=-1, keepdims=True)
        if approx_recip:
            p = p * pl.reciprocal(denom, approx=True)
        else:
            p = p / denom

        if attw_ref is not None:
            attw_ref[:, h, :, :] = p.astype(attw_ref.dtype)

        ctx_h = jnp.einsum("bqk,bkd->bqd", p.astype(md), v_h.astype(md),
                           preferred_element_type=jnp.float32)             # (Bt, S, Dh)
        ctx_ref[:, :, h * head_dim:(h + 1) * head_dim] = ctx_h.astype(ctx_ref.dtype)

    # single K=E output projection (full MXU depth, no per-head K=Dh matmuls)
    attn_out = jnp.dot(ctx_ref[...].reshape(R, E), wo_ref[...],
                       preferred_element_type=jnp.float32) + bo_ref[...]
    # (attn_dropout / proj_dropout are identity in eval)
    x2 = attn_out + x                                 # first residual

    # ---- ffn_norm + MLP, hidden dim chunked to bound the (R, M) intermediate ----
    y = _layernorm(x2, g2_ref[...], b2_ref[...], eps)
    y_md = y.astype(md)
    M = wf1_ref.shape[1]
    mc = mlp_chunk
    acc = jnp.zeros((R, E), jnp.float32)
    for c in range(M // mc):                          # static loop
        lo, hi = c * mc, (c + 1) * mc
        hcol = jnp.dot(y_md, wf1_ref[:, lo:hi],
                       preferred_element_type=jnp.float32) + bf1_ref[:, lo:hi]
        hcol = _gelu_exact(hcol)
        acc = acc + jnp.dot(hcol.astype(md), wf2_ref[lo:hi, :],
                            preferred_element_type=jnp.float32)
    out = acc + bf2_ref[...] + x2                     # second residual

    out_ref[...] = out.reshape(Bt, S, E).astype(out_ref.dtype)


# ------------------------- tiling / VMEM heuristics -------------------------
def _pick_mlp_chunk(M, target=512):
    """Largest divisor of M <= target, preferring multiples of 128."""
    cand = [d for d in range(1, M + 1) if M % d == 0 and d <= target]
    if not cand:
        return M
    m128 = [d for d in cand if d % 128 == 0]
    return max(m128) if m128 else max(cand)


def _estimate_vmem_bytes(Bt, S, E, M, H, mc, x_isz, md_isz, emit_probs, p_isz):
    """Rough per-grid-step working-set estimate (weights + IO blocks + intermediates)."""
    R = Bt * S
    f32 = 4
    weights = (E * 3 * E + E * E + E * M + M * E) * md_isz           # single-buffered
    biases = (3 * E + E + M + E + 4 * E) * f32
    io = 2 * 2 * Bt * S * E * x_isz                                   # x + out, 2-buffered
    if emit_probs:
        io += 2 * Bt * H * S * S * p_isz
    interm = R * (3 * E + 6 * E + mc) * f32 + R * E * md_isz          # qkv, residuals, ctx
    interm += 2 * Bt * S * S * f32                                    # one head's scores/probs
    return weights + biases + io + interm


def _pick_batch_tile(B, S, E, M, H, mc, x_isz, md_isz, emit_probs, p_isz,
                     vmem_budget_bytes, max_rows=4096):
    divisors = [d for d in range(1, B + 1) if B % d == 0]
    feasible = [d for d in divisors
                if d * S <= max_rows
                and _estimate_vmem_bytes(d, S, E, M, H, mc, x_isz, md_isz,
                                         emit_probs, p_isz) <= vmem_budget_bytes]
    if not feasible:
        return 1
    bt = max(feasible)
    # keep >= 2 grid steps when the batch allows it (megacore / dual-TC sharding)
    if B // bt < 2 and B >= 2:
        smaller = [d for d in feasible if B // d >= 2]
        if smaller:
            bt = max(smaller)
    return bt


# --------------------------------- wrapper ----------------------------------
def transformer_block(x, params, num_heads, eps=1e-6, *,
                      compute_dtype=None, batch_tile=None, mlp_chunk=None,
                      return_attention_probs=True, probs_dtype=jnp.float32,
                      approx_recip=None, vmem_limit_bytes=None,
                      single_buffer_weights=True):
    B, S, E = x.shape
    M = params["w_fc1"].shape[-1]
    assert E % num_heads == 0
    head_dim = E // num_heads

    if compute_dtype is None:
        compute_dtype = jnp.bfloat16 if x.dtype == jnp.float32 else x.dtype
    if approx_recip is None:
        # keep returned probs exactly normalized; approx recip only on the no-probs path
        approx_recip = not return_attention_probs

    # Fuse Q/K/V weights/biases and cast weights to compute dtype in JAX-land.
    wqkv = jnp.concatenate([params["wq"], params["wk"], params["wv"]],
                           axis=1).astype(compute_dtype)                  # (E, 3E)
    bqkv = jnp.concatenate([params["bq"], params["bk"], params["bv"]], axis=1)  # (1, 3E) f32
    wo = params["wo"].astype(compute_dtype)
    wf1 = params["w_fc1"].astype(compute_dtype)
    wf2 = params["w_fc2"].astype(compute_dtype)

    x_isz = jnp.dtype(x.dtype).itemsize
    md_isz = jnp.dtype(compute_dtype).itemsize
    p_isz = jnp.dtype(probs_dtype).itemsize

    mc = mlp_chunk if mlp_chunk is not None else _pick_mlp_chunk(M)
    assert M % mc == 0, "mlp_chunk must divide mlp_dim"

    if batch_tile is None:
        Bt = _pick_batch_tile(B, S, E, M, num_heads, mc, x_isz, md_isz,
                              return_attention_probs, p_isz,
                              vmem_budget_bytes=48 * 2**20)
    else:
        Bt = batch_tile
    assert B % Bt == 0, "batch tile must divide batch"
    grid = (B // Bt,)

    est = _estimate_vmem_bytes(Bt, S, E, M, num_heads, mc, x_isz, md_isz,
                               return_attention_probs, p_isz)
    if vmem_limit_bytes is None:
        vmem_limit_bytes = int(min(max(est * 1.3, 32 * 2**20), 64 * 2**20))

    kernel = functools.partial(
        _block_kernel, num_heads=num_heads, head_dim=head_dim, eps=eps,
        compute_dtype=compute_dtype, approx_recip=approx_recip,
        mlp_chunk=mc, emit_probs=return_attention_probs,
    )

    param_shapes = [
        (1, E), (1, E),                  # ln1 gamma, beta
        (E, 3 * E), (1, 3 * E),          # fused wqkv, bqkv
        (E, E), (1, E),                  # wo, bo
        (1, E), (1, E),                  # ln2 gamma, beta
        (E, M), (1, M),                  # fc1
        (M, E), (1, E),                  # fc2
    ]
    args = (
        x,
        params["ln1_g"], params["ln1_b"],
        wqkv, bqkv,
        wo, params["bo"],
        params["ln2_g"], params["ln2_b"],
        wf1, params["b_fc1"],
        wf2, params["b_fc2"],
    )

    def rep_spec(shape, single_buffer):
        idx = lambda b, _n=len(shape): (0,) * _n   # grid-invariant block
        if single_buffer:
            return pl.BlockSpec(shape, idx, pipeline_mode=pl.Buffered(1))
        return pl.BlockSpec(shape, idx)

    def run(single_buffer):
        in_specs = [pl.BlockSpec((Bt, S, E), lambda b: (b, 0, 0))]
        in_specs += [rep_spec(s, single_buffer) for s in param_shapes]

        if return_attention_probs:
            out_specs = (
                pl.BlockSpec((Bt, S, E), lambda b: (b, 0, 0)),
                pl.BlockSpec((Bt, num_heads, S, S), lambda b: (b, 0, 0, 0)),
            )
            out_shape = (
                jax.ShapeDtypeStruct((B, S, E), x.dtype),
                jax.ShapeDtypeStruct((B, num_heads, S, S), probs_dtype),
            )
        else:
            out_specs = pl.BlockSpec((Bt, S, E), lambda b: (b, 0, 0))
            out_shape = jax.ShapeDtypeStruct((B, S, E), x.dtype)

        fn = pl.pallas_call(
            kernel,
            out_shape=out_shape,
            grid=grid,
            in_specs=in_specs,
            out_specs=out_specs,
            scratch_shapes=[pltpu.VMEM((Bt, S, E), compute_dtype)],   # ctx slab
            compiler_params=pltpu.CompilerParams(
                dimension_semantics=("parallel",),
                vmem_limit_bytes=vmem_limit_bytes),
        )
        return fn(*args)

    if single_buffer_weights:
        try:
            res = run(True)
        except Exception:
            # pipeline_mode=pl.Buffered(1) not supported on this build -> default buffering
            res = run(False)
    else:
        res = run(False)

    if return_attention_probs:
        return res
    return res, None


# ---------------- pure-JAX reference for verification ----------------
def _ref_block(x, p, num_heads, eps=1e-6):
    def ln(z, g, b):
        mu = z.mean(-1, keepdims=True)
        var = ((z - mu) ** 2).mean(-1, keepdims=True)
        return (z - mu) / jnp.sqrt(var + eps) * g + b

    B, S, E = x.shape
    Dh = E // num_heads
    h0 = x
    x1 = ln(x, p["ln1_g"][0], p["ln1_b"][0])
    q = x1 @ p["wq"] + p["bq"][0]
    k = x1 @ p["wk"] + p["bk"][0]
    v = x1 @ p["wv"] + p["bv"][0]
    q = q.reshape(B, S, num_heads, Dh).transpose(0, 2, 1, 3)
    k = k.reshape(B, S, num_heads, Dh).transpose(0, 2, 1, 3)
    v = v.reshape(B, S, num_heads, Dh).transpose(0, 2, 1, 3)
    s = jnp.einsum("bhqd,bhkd->bhqk", q, k) / math.sqrt(Dh)
    w = jax.nn.softmax(s, axis=-1)
    ctx = jnp.einsum("bhqk,bhkd->bhqd", w, v).transpose(0, 2, 1, 3).reshape(B, S, E)
    attn_out = ctx @ p["wo"] + p["bo"][0]
    x2 = attn_out + h0
    y = ln(x2, p["ln2_g"][0], p["ln2_b"][0])
    y = y @ p["w_fc1"] + p["b_fc1"][0]
    y = 0.5 * y * (1.0 + jax.lax.erf(y / math.sqrt(2.0)))
    y = y @ p["w_fc2"] + p["b_fc2"][0]
    return y + x2, w


if __name__ == "__main__":
    # small shapes consistent with the module
    B, S, E = 2, 8, 32
    num_heads = 4
    mlp_dim = 64

    key = jax.random.PRNGKey(0)
    ks = jax.random.split(key, 16)
    f32 = jnp.float32

    params = {
        "ln1_g": jnp.ones((1, E), f32),
        "ln1_b": jnp.zeros((1, E), f32),
        "ln2_g": jnp.ones((1, E), f32),
        "ln2_b": jnp.zeros((1, E), f32),
        "wq": 0.05 * jax.random.normal(ks[0], (E, E), f32),
        "bq": 0.01 * jax.random.normal(ks[1], (1, E), f32),
        "wk": 0.05 * jax.random.normal(ks[2], (E, E), f32),
        "bk": 0.01 * jax.random.normal(ks[3], (1, E), f32),
        "wv": 0.05 * jax.random.normal(ks[4], (E, E), f32),
        "bv": 0.01 * jax.random.normal(ks[5], (1, E), f32),
        "wo": 0.05 * jax.random.normal(ks[6], (E, E), f32),
        "bo": 0.01 * jax.random.normal(ks[7], (1, E), f32),
        "w_fc1": 0.05 * jax.random.normal(ks[8], (E, mlp_dim), f32),
        "b_fc1": 1e-6 * jax.random.normal(ks[9], (1, mlp_dim), f32),
        "w_fc2": 0.05 * jax.random.normal(ks[10], (mlp_dim, E), f32),
        "b_fc2": 1e-6 * jax.random.normal(ks[11], (1, E), f32),
    }

    x = jax.random.normal(ks[12], (B, S, E), f32)
    ref_out, ref_w = _ref_block(x, params, num_heads)

    # 1) strict correctness check: f32 matmul operands, exact reciprocal
    out, attw = transformer_block(x, params, num_heads,
                                  compute_dtype=jnp.float32, approx_recip=False)
    out = jax.block_until_ready(out)
    attw = jax.block_until_ready(attw)
    assert out.shape == (B, S, E) and attw.shape == (B, num_heads, S, S)
    assert jnp.allclose(out, ref_out, atol=1e-4, rtol=1e-4), "f32 output mismatch"
    assert jnp.allclose(attw, ref_w, atol=1e-5, rtol=1e-5), "f32 attention-weight mismatch"

    # 2) default perf config: bf16 matmul operands (f32 accumulation), probs returned
    out_bf, attw_bf = transformer_block(x, params, num_heads)
    out_bf = jax.block_until_ready(out_bf)
    attw_bf = jax.block_until_ready(attw_bf)
    assert jnp.allclose(out_bf, ref_out, atol=1e-1, rtol=1e-1), "bf16 output mismatch"
    assert jnp.allclose(attw_bf, ref_w, atol=2e-2, rtol=2e-2), "bf16 attn-weight mismatch"

    # 3) attention-prob output skipped (lane-dense/write-skip fast path, approx recip)
    out_np, no_w = transformer_block(x, params, num_heads,
                                     return_attention_probs=False)
    out_np = jax.block_until_ready(out_np)
    assert no_w is None
    assert jnp.allclose(out_np, ref_out, atol=1e-1, rtol=1e-1), "no-probs output mismatch"

    print("KERNEL_OK")
</pallas_src>

<mosaic_0001>
module attributes {stable_mosaic.version = 11 : i64} {
  func.func @_block_kernel(%arg0: i32, %arg1: memref<1x8x32xf32, #tpu.memory_space<vmem>>, %arg2: memref<1x32xf32, #tpu.memory_space<vmem>>, %arg3: memref<1x32xf32, #tpu.memory_space<vmem>>, %arg4: memref<32x96xf32, #tpu.memory_space<vmem>>, %arg5: memref<1x96xf32, #tpu.memory_space<vmem>>, %arg6: memref<32x32xf32, #tpu.memory_space<vmem>>, %arg7: memref<1x32xf32, #tpu.memory_space<vmem>>, %arg8: memref<1x32xf32, #tpu.memory_space<vmem>>, %arg9: memref<1x32xf32, #tpu.memory_space<vmem>>, %arg10: memref<32x64xf32, #tpu.memory_space<vmem>>, %arg11: memref<1x64xf32, #tpu.memory_space<vmem>>, %arg12: memref<64x32xf32, #tpu.memory_space<vmem>>, %arg13: memref<1x32xf32, #tpu.memory_space<vmem>>, %arg14: memref<1x8x32xf32, #tpu.memory_space<vmem>>, %arg15: memref<1x4x8x8xf32, #tpu.memory_space<vmem>>, %arg16: memref<1x8x32xf32, #tpu.memory_space<vmem>>) attributes {dimension_semantics = [#tpu.dimension_semantics<parallel>], iteration_bounds = array<i64: 2>, scalar_prefetch = 0 : i64, scratch_operands = 1 : i64, tpu.core_type = #tpu.core_type<tc>, window_params = [{transform_indices = @transform_0, window_bounds = array<i64: 1, 8, 32>}, {pipeline_mode = #tpu.pipeline_mode<synchronous>, transform_indices = @transform_1, window_bounds = array<i64: 1, 32>}, {pipeline_mode = #tpu.pipeline_mode<synchronous>, transform_indices = @transform_2, window_bounds = array<i64: 1, 32>}, {pipeline_mode = #tpu.pipeline_mode<synchronous>, transform_indices = @transform_3, window_bounds = array<i64: 32, 96>}, {pipeline_mode = #tpu.pipeline_mode<synchronous>, transform_indices = @transform_4, window_bounds = array<i64: 1, 96>}, {pipeline_mode = #tpu.pipeline_mode<synchronous>, transform_indices = @transform_5, window_bounds = array<i64: 32, 32>}, {pipeline_mode = #tpu.pipeline_mode<synchronous>, transform_indices = @transform_6, window_bounds = array<i64: 1, 32>}, {pipeline_mode = #tpu.pipeline_mode<synchronous>, transform_indices = @transform_7, window_bounds = array<i64: 1, 32>}, {pipeline_mode = #tpu.pipeline_mode<synchronous>, transform_indices = @transform_8, window_bounds = array<i64: 1, 32>}, {pipeline_mode = #tpu.pipeline_mode<synchronous>, transform_indices = @transform_9, window_bounds = array<i64: 32, 64>}, {pipeline_mode = #tpu.pipeline_mode<synchronous>, transform_indices = @transform_10, window_bounds = array<i64: 1, 64>}, {pipeline_mode = #tpu.pipeline_mode<synchronous>, transform_indices = @transform_11, window_bounds = array<i64: 64, 32>}, {pipeline_mode = #tpu.pipeline_mode<synchronous>, transform_indices = @transform_12, window_bounds = array<i64: 1, 32>}, {transform_indices = @transform_13, window_bounds = array<i64: 1, 8, 32>}, {transform_indices = @transform_14, window_bounds = array<i64: 1, 4, 8, 8>}]} {
    %c0 = arith.constant 0 : index
    %c0_0 = arith.constant 0 : index
    %c0_1 = arith.constant 0 : index
    %0 = vector.load %arg1[%c0, %c0_0, %c0_1] : memref<1x8x32xf32, #tpu.memory_space<vmem>>, vector<1x8x32xf32>
    %1 = vector.shape_cast %0 : vector<1x8x32xf32> to vector<8x32xf32>
    %c0_2 = arith.constant 0 : index
    %c0_3 = arith.constant 0 : index
    %2 = vector.load %arg2[%c0_2, %c0_3] : memref<1x32xf32, #tpu.memory_space<vmem>>, vector<1x32xf32>
    %c0_4 = arith.constant 0 : index
    %c0_5 = arith.constant 0 : index
    %3 = vector.load %arg3[%c0_4, %c0_5] : memref<1x32xf32, #tpu.memory_space<vmem>>, vector<1x32xf32>
    %cst = arith.constant dense<0.000000e+00> : vector<8xf32>
    %4 = vector.multi_reduction <add>, %1, %cst [1] : vector<8x32xf32> to vector<8xf32>
    %5 = vector.shape_cast %4 : vector<8xf32> to vector<8x1xf32>
    %cst_6 = arith.constant 3.200000e+01 : f32
    %6 = vector.broadcast %cst_6 : f32 to vector<8x1xf32>
    %7 = arith.divf %5, %6 : vector<8x1xf32>
    %8 = vector.broadcast %7 : vector<8x1xf32> to vector<8x32xf32>
    %9 = arith.subf %1, %8 : vector<8x32xf32>
    %10 = arith.mulf %9, %9 : vector<8x32xf32>
    %cst_7 = arith.constant dense<0.000000e+00> : vector<8xf32>
    %11 = vector.multi_reduction <add>, %10, %cst_7 [1] : vector<8x32xf32> to vector<8xf32>
    %12 = vector.shape_cast %11 : vector<8xf32> to vector<8x1xf32>
    %cst_8 = arith.constant 3.200000e+01 : f32
    %13 = vector.broadcast %cst_8 : f32 to vector<8x1xf32>
    %14 = arith.divf %12, %13 : vector<8x1xf32>
    %15 = vector.broadcast %7 : vector<8x1xf32> to vector<8x32xf32>
    %16 = arith.subf %1, %15 : vector<8x32xf32>
    %cst_9 = arith.constant 9.99999997E-7 : f32
    %17 = vector.broadcast %cst_9 : f32 to vector<8x1xf32>
    %18 = arith.addf %14, %17 : vector<8x1xf32>
    %19 = math.rsqrt %18 : vector<8x1xf32>
    %20 = vector.broadcast %19 : vector<8x1xf32> to vector<8x32xf32>
    %21 = arith.mulf %16, %20 : vector<8x32xf32>
    %22 = vector.broadcast %2 : vector<1x32xf32> to vector<8x32xf32>
    %23 = arith.mulf %21, %22 : vector<8x32xf32>
    %24 = vector.broadcast %3 : vector<1x32xf32> to vector<8x32xf32>
    %25 = arith.addf %23, %24 : vector<8x32xf32>
    %c0_10 = arith.constant 0 : index
    %c0_11 = arith.constant 0 : index
    %26 = vector.load %arg4[%c0_10, %c0_11] : memref<32x96xf32, #tpu.memory_space<vmem>>, vector<32x96xf32>
    %cst_12 = arith.constant dense<0.000000e+00> : vector<8x96xf32>
    %27 = tpu.matmul %25, %26, %cst_12 {dimension_numbers = #tpu.dot_dimension_numbers<[1], [0], [0], [1], [0, 0, 1, 1], [], []>} : vector<8x32xf32>, vector<32x96xf32>, vector<8x96xf32> -> vector<8x96xf32>
    %c0_13 = arith.constant 0 : index
    %c0_14 = arith.constant 0 : index
    %28 = vector.load %arg5[%c0_13, %c0_14] : memref<1x96xf32, #tpu.memory_space<vmem>>, vector<1x96xf32>
    %29 = vector.broadcast %28 : vector<1x96xf32> to vector<8x96xf32>
    %30 = arith.addf %27, %29 : vector<8x96xf32>
    %31 = vector.shape_cast %30 : vector<8x96xf32> to vector<1x8x96xf32>
    %32 = vector.extract_strided_slice %31 {offsets = [0, 0, 0], sizes = [1, 8, 8], strides = [1, 1, 1]} : vector<1x8x96xf32> to vector<1x8x8xf32>
    %33 = vector.extract_strided_slice %31 {offsets = [0, 0, 32], sizes = [1, 8, 8], strides = [1, 1, 1]} : vector<1x8x96xf32> to vector<1x8x8xf32>
    %34 = vector.extract_strided_slice %31 {offsets = [0, 0, 64], sizes = [1, 8, 8], strides = [1, 1, 1]} : vector<1x8x96xf32> to vector<1x8x8xf32>
    "tpu.trace_start"() <{level = 10 : i32, message = "bqd,bkd->bqk"}> : () -> ()
    %cst_15 = arith.constant dense<0.000000e+00> : vector<1x8x8xf32>
    %35 = tpu.matmul %32, %33, %cst_15 {dimension_numbers = #tpu.dot_dimension_numbers<[2], [2], [1], [1], [0, 0, 0, 1, 1, 1], [0], [0]>} : vector<1x8x8xf32>, vector<1x8x8xf32>, vector<1x8x8xf32> -> vector<1x8x8xf32>
    "tpu.trace_stop"() : () -> ()
    %cst_16 = arith.constant 0.353553385 : f32
    %36 = vector.broadcast %cst_16 : f32 to vector<1x8x8xf32>
    %37 = arith.mulf %35, %36 : vector<1x8x8xf32>
    %cst_17 = arith.constant dense<0xFF800000> : vector<1x8xf32>
    %38 = vector.multi_reduction <maximumf>, %37, %cst_17 [2] : vector<1x8x8xf32> to vector<1x8xf32>
    %39 = vector.shape_cast %38 : vector<1x8xf32> to vector<1x8x1xf32>
    %40 = vector.broadcast %39 : vector<1x8x1xf32> to vector<1x8x8xf32>
    %41 = arith.subf %37, %40 : vector<1x8x8xf32>
    %42 = math.exp %41 : vector<1x8x8xf32>
    %cst_18 = arith.constant dense<0.000000e+00> : vector<1x8xf32>
    %43 = vector.multi_reduction <add>, %42, %cst_18 [2] : vector<1x8x8xf32> to vector<1x8xf32>
    %44 = vector.shape_cast %43 : vector<1x8xf32> to vector<1x8x1xf32>
    %45 = vector.broadcast %44 : vector<1x8x1xf32> to vector<1x8x8xf32>
    %46 = arith.divf %42, %45 : vector<1x8x8xf32>
    %c0_19 = arith.constant 0 : index
    %c0_20 = arith.constant 0 : index
    %c0_21 = arith.constant 0 : index
    %c0_22 = arith.constant 0 : index
    %47 = vector.load %arg15[%c0_19, %c0_20, %c0_21, %c0_22] : memref<1x4x8x8xf32, #tpu.memory_space<vmem>>, vector<1x1x8x8xf32>
    %48 = vector.shape_cast %47 : vector<1x1x8x8xf32> to vector<1x8x8xf32>
    %49 = vector.shape_cast %46 : vector<1x8x8xf32> to vector<1x1x8x8xf32>
    tpu.vector_store %arg15[%c0_19, %c0_20, %c0_21, %c0_22], %49 {strides = array<i32>} : memref<1x4x8x8xf32, #tpu.memory_space<vmem>>, vector<1x1x8x8xf32>,
    "tpu.trace_start"() <{level = 10 : i32, message = "bqk,bkd->bqd"}> : () -> ()
    %cst_23 = arith.constant dense<0.000000e+00> : vector<1x8x8xf32>
    %50 = tpu.matmul %46, %34, %cst_23 {dimension_numbers = #tpu.dot_dimension_numbers<[2], [1], [1], [2], [0, 0, 0, 1, 1, 2], [0], [0]>} : vector<1x8x8xf32>, vector<1x8x8xf32>, vector<1x8x8xf32> -> vector<1x8x8xf32>
    "tpu.trace_stop"() : () -> ()
    %c0_24 = arith.constant 0 : index
    %c0_25 = arith.constant 0 : index
    %c0_26 = arith.constant 0 : index
    %51 = vector.load %arg16[%c0_24, %c0_25, %c0_26] : memref<1x8x32xf32, #tpu.memory_space<vmem>>, vector<1x8x8xf32>
    tpu.vector_store %arg16[%c0_24, %c0_25, %c0_26], %50 {strides = array<i32>} : memref<1x8x32xf32, #tpu.memory_space<vmem>>, vector<1x8x8xf32>,
    %52 = vector.extract_strided_slice %31 {offsets = [0, 0, 8], sizes = [1, 8, 8], strides = [1, 1, 1]} : vector<1x8x96xf32> to vector<1x8x8xf32>
    %53 = vector.extract_strided_slice %31 {offsets = [0, 0, 40], sizes = [1, 8, 8], strides = [1, 1, 1]} : vector<1x8x96xf32> to vector<1x8x8xf32>
    %54 = vector.extract_strided_slice %31 {offsets = [0, 0, 72], sizes = [1, 8, 8], strides = [1, 1, 1]} : vector<1x8x96xf32> to vector<1x8x8xf32>
    "tpu.trace_start"() <{level = 10 : i32, message = "bqd,bkd->bqk"}> : () -> ()
    %cst_27 = arith.constant dense<0.000000e+00> : vector<1x8x8xf32>
    %55 = tpu.matmul %52, %53, %cst_27 {dimension_numbers = #tpu.dot_dimension_numbers<[2], [2], [1], [1], [0, 0, 0, 1, 1, 1], [0], [0]>} : vector<1x8x8xf32>, vector<1x8x8xf32>, vector<1x8x8xf32> -> vector<1x8x8xf32>
    "tpu.trace_stop"() : () -> ()
    %cst_28 = arith.constant 0.353553385 : f32
    %56 = vector.broadcast %cst_28 : f32 to vector<1x8x8xf32>
    %57 = arith.mulf %55, %56 : vector<1x8x8xf32>
    %cst_29 = arith.constant dense<0xFF800000> : vector<1x8xf32>
    %58 = vector.multi_reduction <maximumf>, %57, %cst_29 [2] : vector<1x8x8xf32> to vector<1x8xf32>
    %59 = vector.shape_cast %58 : vector<1x8xf32> to vector<1x8x1xf32>
    %60 = vector.broadcast %59 : vector<1x8x1xf32> to vector<1x8x8xf32>
    %61 = arith.subf %57, %60 : vector<1x8x8xf32>
    %62 = math.exp %61 : vector<1x8x8xf32>
    %cst_30 = arith.constant dense<0.000000e+00> : vector<1x8xf32>
    %63 = vector.multi_reduction <add>, %62, %cst_30 [2] : vector<1x8x8xf32> to vector<1x8xf32>
    %64 = vector.shape_cast %63 : vector<1x8xf32> to vector<1x8x1xf32>
    %65 = vector.broadcast %64 : vector<1x8x1xf32> to vector<1x8x8xf32>
    %66 = arith.divf %62, %65 : vector<1x8x8xf32>
    %c0_31 = arith.constant 0 : index
    %c1 = arith.constant 1 : index
    %c0_32 = arith.constant 0 : index
    %c0_33 = arith.constant 0 : index
    %67 = vector.load %arg15[%c0_31, %c1, %c0_32, %c0_33] : memref<1x4x8x8xf32, #tpu.memory_space<vmem>>, vector<1x1x8x8xf32>
    %68 = vector.shape_cast %67 : vector<1x1x8x8xf32> to vector<1x8x8xf32>
    %69 = vector.shape_cast %66 : vector<1x8x8xf32> to vector<1x1x8x8xf32>
    tpu.vector_store %arg15[%c0_31, %c1, %c0_32, %c0_33], %69 {strides = array<i32>} : memref<1x4x8x8xf32, #tpu.memory_space<vmem>>, vector<1x1x8x8xf32>,
    "tpu.trace_start"() <{level = 10 : i32, message = "bqk,bkd->bqd"}> : () -> ()
    %cst_34 = arith.constant dense<0.000000e+00> : vector<1x8x8xf32>
    %70 = tpu.matmul %66, %54, %cst_34 {dimension_numbers = #tpu.dot_dimension_numbers<[2], [1], [1], [2], [0, 0, 0, 1, 1, 2], [0], [0]>} : vector<1x8x8xf32>, vector<1x8x8xf32>, vector<1x8x8xf32> -> vector<1x8x8xf32>
    "tpu.trace_stop"() : () -> ()
    %c0_35 = arith.constant 0 : index
    %c0_36 = arith.constant 0 : index
    %c8 = arith.constant 8 : index
    %71 = vector.load %arg16[%c0_35, %c0_36, %c8] : memref<1x8x32xf32, #tpu.memory_space<vmem>>, vector<1x8x8xf32>
    tpu.vector_store %arg16[%c0_35, %c0_36, %c8], %70 {strides = array<i32>} : memref<1x8x32xf32, #tpu.memory_space<vmem>>, vector<1x8x8xf32>,
    %72 = vector.extract_strided_slice %31 {offsets = [0, 0, 16], sizes = [1, 8, 8], strides = [1, 1, 1]} : vector<1x8x96xf32> to vector<1x8x8xf32>
    %73 = vector.extract_strided_slice %31 {offsets = [0, 0, 48], sizes = [1, 8, 8], strides = [1, 1, 1]} : vector<1x8x96xf32> to vector<1x8x8xf32>
    %74 = vector.extract_strided_slice %31 {offsets = [0, 0, 80], sizes = [1, 8, 8], strides = [1, 1, 1]} : vector<1x8x96xf32> to vector<1x8x8xf32>
    "tpu.trace_start"() <{level = 10 : i32, message = "bqd,bkd->bqk"}> : () -> ()
    %cst_37 = arith.constant dense<0.000000e+00> : vector<1x8x8xf32>
    %75 = tpu.matmul %72, %73, %cst_37 {dimension_numbers = #tpu.dot_dimension_numbers<[2], [2], [1], [1], [0, 0, 0, 1, 1, 1], [0], [0]>} : vector<1x8x8xf32>, vector<1x8x8xf32>, vector<1x8x8xf32> -> vector<1x8x8xf32>
    "tpu.trace_stop"() : () -> ()
    %cst_38 = arith.constant 0.353553385 : f32
    %76 = vector.broadcast %cst_38 : f32 to vector<1x8x8xf32>
    %77 = arith.mulf %75, %76 : vector<1x8x8xf32>
    %cst_39 = arith.constant dense<0xFF800000> : vector<1x8xf32>
    %78 = vector.multi_reduction <maximumf>, %77, %cst_39 [2] : vector<1x8x8xf32> to vector<1x8xf32>
    %79 = vector.shape_cast %78 : vector<1x8xf32> to vector<1x8x1xf32>
    %80 = vector.broadcast %79 : vector<1x8x1xf32> to vector<1x8x8xf32>
    %81 = arith.subf %77, %80 : vector<1x8x8xf32>
    %82 = math.exp %81 : vector<1x8x8xf32>
    %cst_40 = arith.constant dense<0.000000e+00> : vector<1x8xf32>
    %83 = vector.multi_reduction <add>, %82, %cst_40 [2] : vector<1x8x8xf32> to vector<1x8xf32>
    %84 = vector.shape_cast %83 : vector<1x8xf32> to vector<1x8x1xf32>
    %85 = vector.broadcast %84 : vector<1x8x1xf32> to vector<1x8x8xf32>
    %86 = arith.divf %82, %85 : vector<1x8x8xf32>
    %c0_41 = arith.constant 0 : index
    %c2 = arith.constant 2 : index
    %c0_42 = arith.constant 0 : index
    %c0_43 = arith.constant 0 : index
    %87 = vector.load %arg15[%c0_41, %c2, %c0_42, %c0_43] : memref<1x4x8x8xf32, #tpu.memory_space<vmem>>, vector<1x1x8x8xf32>
    %88 = vector.shape_cast %87 : vector<1x1x8x8xf32> to vector<1x8x8xf32>
    %89 = vector.shape_cast %86 : vector<1x8x8xf32> to vector<1x1x8x8xf32>
    tpu.vector_store %arg15[%c0_41, %c2, %c0_42, %c0_43], %89 {strides = array<i32>} : memref<1x4x8x8xf32, #tpu.memory_space<vmem>>, vector<1x1x8x8xf32>,
    "tpu.trace_start"() <{level = 10 : i32, message = "bqk,bkd->bqd"}> : () -> ()
    %cst_44 = arith.constant dense<0.000000e+00> : vector<1x8x8xf32>
    %90 = tpu.matmul %86, %74, %cst_44 {dimension_numbers = #tpu.dot_dimension_numbers<[2], [1], [1], [2], [0, 0, 0, 1, 1, 2], [0], [0]>} : vector<1x8x8xf32>, vector<1x8x8xf32>, vector<1x8x8xf32> -> vector<1x8x8xf32>
    "tpu.trace_stop"() : () -> ()
    %c0_45 = arith.constant 0 : index
    %c0_46 = arith.constant 0 : index
    %c16 = arith.constant 16 : index
    %91 = vector.load %arg16[%c0_45, %c0_46, %c16] : memref<1x8x32xf32, #tpu.memory_space<vmem>>, vector<1x8x8xf32>
    tpu.vector_store %arg16[%c0_45, %c0_46, %c16], %90 {strides = array<i32>} : memref<1x8x32xf32, #tpu.memory_space<vmem>>, vector<1x8x8xf32>,
    %92 = vector.extract_strided_slice %31 {offsets = [0, 0, 24], sizes = [1, 8, 8], strides = [1, 1, 1]} : vector<1x8x96xf32> to vector<1x8x8xf32>
    %93 = vector.extract_strided_slice %31 {offsets = [0, 0, 56], sizes = [1, 8, 8], strides = [1, 1, 1]} : vector<1x8x96xf32> to vector<1x8x8xf32>
    %94 = vector.extract_strided_slice %31 {offsets = [0, 0, 88], sizes = [1, 8, 8], strides = [1, 1, 1]} : vector<1x8x96xf32> to vector<1x8x8xf32>
    "tpu.trace_start"() <{level = 10 : i32, message = "bqd,bkd->bqk"}> : () -> ()
    %cst_47 = arith.constant dense<0.000000e+00> : vector<1x8x8xf32>
    %95 = tpu.matmul %92, %93, %cst_47 {dimension_numbers = #tpu.dot_dimension_numbers<[2], [2], [1], [1], [0, 0, 0, 1, 1, 1], [0], [0]>} : vector<1x8x8xf32>, vector<1x8x8xf32>, vector<1x8x8xf32> -> vector<1x8x8xf32>
    "tpu.trace_stop"() : () -> ()
    %cst_48 = arith.constant 0.353553385 : f32
    %96 = vector.broadcast %cst_48 : f32 to vector<1x8x8xf32>
    %97 = arith.mulf %95, %96 : vector<1x8x8xf32>
    %cst_49 = arith.constant dense<0xFF800000> : vector<1x8xf32>
    %98 = vector.multi_reduction <maximumf>, %97, %cst_49 [2] : vector<1x8x8xf32> to vector<1x8xf32>
    %99 = vector.shape_cast %98 : vector<1x8xf32> to vector<1x8x1xf32>
    %100 = vector.broadcast %99 : vector<1x8x1xf32> to vector<1x8x8xf32>
    %101 = arith.subf %97, %100 : vector<1x8x8xf32>
    %102 = math.exp %101 : vector<1x8x8xf32>
    %cst_50 = arith.constant dense<0.000000e+00> : vector<1x8xf32>
    %103 = vector.multi_reduction <add>, %102, %cst_50 [2] : vector<1x8x8xf32> to vector<1x8xf32>
    %104 = vector.shape_cast %103 : vector<1x8xf32> to vector<1x8x1xf32>
    %105 = vector.broadcast %104 : vector<1x8x1xf32> to vector<1x8x8xf32>
    %106 = arith.divf %102, %105 : vector<1x8x8xf32>
    %c0_51 = arith.constant 0 : index
    %c3 = arith.constant 3 : index
    %c0_52 = arith.constant 0 : index
    %c0_53 = arith.constant 0 : index
    %107 = vector.load %arg15[%c0_51, %c3, %c0_52, %c0_53] : memref<1x4x8x8xf32, #tpu.memory_space<vmem>>, vector<1x1x8x8xf32>
    %108 = vector.shape_cast %107 : vector<1x1x8x8xf32> to vector<1x8x8xf32>
    %109 = vector.shape_cast %106 : vector<1x8x8xf32> to vector<1x1x8x8xf32>
    tpu.vector_store %arg15[%c0_51, %c3, %c0_52, %c0_53], %109 {strides = array<i32>} : memref<1x4x8x8xf32, #tpu.memory_space<vmem>>, vector<1x1x8x8xf32>,
    "tpu.trace_start"() <{level = 10 : i32, message = "bqk,bkd->bqd"}> : () -> ()
    %cst_54 = arith.constant dense<0.000000e+00> : vector<1x8x8xf32>
    %110 = tpu.matmul %106, %94, %cst_54 {dimension_numbers = #tpu.dot_dimension_numbers<[2], [1], [1], [2], [0, 0, 0, 1, 1, 2], [0], [0]>} : vector<1x8x8xf32>, vector<1x8x8xf32>, vector<1x8x8xf32> -> vector<1x8x8xf32>
    "tpu.trace_stop"() : () -> ()
    %c0_55 = arith.constant 0 : index
    %c0_56 = arith.constant 0 : index
    %c24 = arith.constant 24 : index
    %111 = vector.load %arg16[%c0_55, %c0_56, %c24] : memref<1x8x32xf32, #tpu.memory_space<vmem>>, vector<1x8x8xf32>
    tpu.vector_store %arg16[%c0_55, %c0_56, %c24], %110 {strides = array<i32>} : memref<1x8x32xf32, #tpu.memory_space<vmem>>, vector<1x8x8xf32>,
    %c0_57 = arith.constant 0 : index
    %c0_58 = arith.constant 0 : index
    %c0_59 = arith.constant 0 : index
    %112 = vector.load %arg16[%c0_57, %c0_58, %c0_59] : memref<1x8x32xf32, #tpu.memory_space<vmem>>, vector<1x8x32xf32>
    %113 = vector.shape_cast %112 : vector<1x8x32xf32> to vector<8x32xf32>
    %c0_60 = arith.constant 0 : index
    %c0_61 = arith.constant 0 : index
    %114 = vector.load %arg6[%c0_60, %c0_61] : memref<32x32xf32, #tpu.memory_space<vmem>>, vector<32x32xf32>
    %cst_62 = arith.constant dense<0.000000e+00> : vector<8x32xf32>
    %115 = tpu.matmul %113, %114, %cst_62 {dimension_numbers = #tpu.dot_dimension_numbers<[1], [0], [0], [1], [0, 0, 1, 1], [], []>} : vector<8x32xf32>, vector<32x32xf32>, vector<8x32xf32> -> vector<8x32xf32>
    %c0_63 = arith.constant 0 : index
    %c0_64 = arith.constant 0 : index
    %116 = vector.load %arg7[%c0_63, %c0_64] : memref<1x32xf32, #tpu.memory_space<vmem>>, vector<1x32xf32>
    %117 = vector.broadcast %116 : vector<1x32xf32> to vector<8x32xf32>
    %118 = arith.addf %115, %117 : vector<8x32xf32>
    %119 = arith.addf %118, %1 : vector<8x32xf32>
    %c0_65 = arith.constant 0 : index
    %c0_66 = arith.constant 0 : index
    %120 = vector.load %arg8[%c0_65, %c0_66] : memref<1x32xf32, #tpu.memory_space<vmem>>, vector<1x32xf32>
    %c0_67 = arith.constant 0 : index
    %c0_68 = arith.constant 0 : index
    %121 = vector.load %arg9[%c0_67, %c0_68] : memref<1x32xf32, #tpu.memory_space<vmem>>, vector<1x32xf32>
    %cst_69 = arith.constant dense<0.000000e+00> : vector<8xf32>
    %122 = vector.multi_reduction <add>, %119, %cst_69 [1] : vector<8x32xf32> to vector<8xf32>
    %123 = vector.shape_cast %122 : vector<8xf32> to vector<8x1xf32>
    %cst_70 = arith.constant 3.200000e+01 : f32
    %124 = vector.broadcast %cst_70 : f32 to vector<8x1xf32>
    %125 = arith.divf %123, %124 : vector<8x1xf32>
    %126 = vector.broadcast %125 : vector<8x1xf32> to vector<8x32xf32>
    %127 = arith.subf %119, %126 : vector<8x32xf32>
    %128 = arith.mulf %127, %127 : vector<8x32xf32>
    %cst_71 = arith.constant dense<0.000000e+00> : vector<8xf32>
    %129 = vector.multi_reduction <add>, %128, %cst_71 [1] : vector<8x32xf32> to vector<8xf32>
    %130 = vector.shape_cast %129 : vector<8xf32> to vector<8x1xf32>
    %cst_72 = arith.constant 3.200000e+01 : f32
    %131 = vector.broadcast %cst_72 : f32 to vector<8x1xf32>
    %132 = arith.divf %130, %131 : vector<8x1xf32>
    %133 = vector.broadcast %125 : vector<8x1xf32> to vector<8x32xf32>
    %134 = arith.subf %119, %133 : vector<8x32xf32>
    %cst_73 = arith.constant 9.99999997E-7 : f32
    %135 = vector.broadcast %cst_73 : f32 to vector<8x1xf32>
    %136 = arith.addf %132, %135 : vector<8x1xf32>
    %137 = math.rsqrt %136 : vector<8x1xf32>
    %138 = vector.broadcast %137 : vector<8x1xf32> to vector<8x32xf32>
    %139 = arith.mulf %134, %138 : vector<8x32xf32>
    %140 = vector.broadcast %120 : vector<1x32xf32> to vector<8x32xf32>
    %141 = arith.mulf %139, %140 : vector<8x32xf32>
    %142 = vector.broadcast %121 : vector<1x32xf32> to vector<8x32xf32>
    %143 = arith.addf %141, %142 : vector<8x32xf32>
    %cst_74 = arith.constant 0.000000e+00 : f32
    %144 = vector.broadcast %cst_74 : f32 to vector<8x32xf32>
    %c0_75 = arith.constant 0 : index
    %c0_76 = arith.constant 0 : index
    %145 = vector.load %arg10[%c0_75, %c0_76] : memref<32x64xf32, #tpu.memory_space<vmem>>, vector<32x64xf32>
    %cst_77 = arith.constant dense<0.000000e+00> : vector<8x64xf32>
    %146 = tpu.matmul %143, %145, %cst_77 {dimension_numbers = #tpu.dot_dimension_numbers<[1], [0], [0], [1], [0, 0, 1, 1], [], []>} : vector<8x32xf32>, vector<32x64xf32>, vector<8x64xf32> -> vector<8x64xf32>
    %c0_78 = arith.constant 0 : index
    %c0_79 = arith.constant 0 : index
    %147 = vector.load %arg11[%c0_78, %c0_79] : memref<1x64xf32, #tpu.memory_space<vmem>>, vector<1x64xf32>
    %148 = vector.broadcast %147 : vector<1x64xf32> to vector<8x64xf32>
    %149 = arith.addf %146, %148 : vector<8x64xf32>
    %cst_80 = arith.constant 5.000000e-01 : f32
    %150 = vector.broadcast %cst_80 : f32 to vector<8x64xf32>
    %151 = arith.mulf %150, %149 : vector<8x64xf32>
    %cst_81 = arith.constant 0.707106769 : f32
    %152 = vector.broadcast %cst_81 : f32 to vector<8x64xf32>
    %153 = arith.mulf %149, %152 : vector<8x64xf32>
    %154 = math.erf %153 : vector<8x64xf32>
    %cst_82 = arith.constant 1.000000e+00 : f32
    %155 = vector.broadcast %cst_82 : f32 to vector<8x64xf32>
    %156 = arith.addf %155, %154 : vector<8x64xf32>
    %157 = arith.mulf %151, %156 : vector<8x64xf32>
    %c0_83 = arith.constant 0 : index
    %c0_84 = arith.constant 0 : index
    %158 = vector.load %arg12[%c0_83, %c0_84] : memref<64x32xf32, #tpu.memory_space<vmem>>, vector<64x32xf32>
    %cst_85 = arith.constant dense<0.000000e+00> : vector<8x32xf32>
    %159 = tpu.matmul %157, %158, %cst_85 {dimension_numbers = #tpu.dot_dimension_numbers<[1], [0], [0], [1], [0, 0, 1, 1], [], []>} : vector<8x64xf32>, vector<64x32xf32>, vector<8x32xf32> -> vector<8x32xf32>
    %160 = arith.addf %144, %159 : vector<8x32xf32>
    %c0_86 = arith.constant 0 : index
    %c0_87 = arith.constant 0 : index
    %161 = vector.load %arg13[%c0_86, %c0_87] : memref<1x32xf32, #tpu.memory_space<vmem>>, vector<1x32xf32>
    %162 = vector.broadcast %161 : vector<1x32xf32> to vector<8x32xf32>
    %163 = arith.addf %160, %162 : vector<8x32xf32>
    %164 = arith.addf %163, %119 : vector<8x32xf32>
    %165 = vector.shape_cast %164 : vector<8x32xf32> to vector<1x8x32xf32>
    %c0_88 = arith.constant 0 : index
    %c0_89 = arith.constant 0 : index
    %c0_90 = arith.constant 0 : index
    %166 = vector.load %arg14[%c0_88, %c0_89, %c0_90] : memref<1x8x32xf32, #tpu.memory_space<vmem>>, vector<1x8x32xf32>
    tpu.vector_store %arg14[%c0_88, %c0_89, %c0_90], %165 {strides = array<i32>} : memref<1x8x32xf32, #tpu.memory_space<vmem>>, vector<1x8x32xf32>,
    return
  }
  func.func @transform_0(%arg0: i32) -> (i32, i32, i32) {
    %c0_i32 = arith.constant 0 : i32
    %c0_i32_0 = arith.constant 0 : i32
    %c0_i32_1 = arith.constant 0 : i32
    return %arg0, %c0_i32, %c0_i32_0 : i32, i32, i32
  }
  func.func @transform_1(%arg0: i32) -> (i32, i32) {
    %c0_i32 = arith.constant 0 : i32
    %c0_i32_0 = arith.constant 0 : i32
    %c0_i32_1 = arith.constant 0 : i32
    return %c0_i32, %c0_i32_0 : i32, i32
  }
  func.func @transform_2(%arg0: i32) -> (i32, i32) {
    %c0_i32 = arith.constant 0 : i32
    %c0_i32_0 = arith.constant 0 : i32
    %c0_i32_1 = arith.constant 0 : i32
    return %c0_i32, %c0_i32_0 : i32, i32
  }
  func.func @transform_3(%arg0: i32) -> (i32, i32) {
    %c0_i32 = arith.constant 0 : i32
    %c0_i32_0 = arith.constant 0 : i32
    %c0_i32_1 = arith.constant 0 : i32
    return %c0_i32, %c0_i32_0 : i32, i32
  }
  func.func @transform_4(%arg0: i32) -> (i32, i32) {
    %c0_i32 = arith.constant 0 : i32
    %c0_i32_0 = arith.constant 0 : i32
    %c0_i32_1 = arith.constant 0 : i32
    return %c0_i32, %c0_i32_0 : i32, i32
  }
  func.func @transform_5(%arg0: i32) -> (i32, i32) {
    %c0_i32 = arith.constant 0 : i32
    %c0_i32_0 = arith.constant 0 : i32
    %c0_i32_1 = arith.constant 0 : i32
    return %c0_i32, %c0_i32_0 : i32, i32
  }
  func.func @transform_6(%arg0: i32) -> (i32, i32) {
    %c0_i32 = arith.constant 0 : i32
    %c0_i32_0 = arith.constant 0 : i32
    %c0_i32_1 = arith.constant 0 : i32
    return %c0_i32, %c0_i32_0 : i32, i32
  }
  func.func @transform_7(%arg0: i32) -> (i32, i32) {
    %c0_i32 = arith.constant 0 : i32
    %c0_i32_0 = arith.constant 0 : i32
    %c0_i32_1 = arith.constant 0 : i32
    return %c0_i32, %c0_i32_0 : i32, i32
  }
  func.func @transform_8(%arg0: i32) -> (i32, i32) {
    %c0_i32 = arith.constant 0 : i32
    %c0_i32_0 = arith.constant 0 : i32
    %c0_i32_1 = arith.constant 0 : i32
    return %c0_i32, %c0_i32_0 : i32, i32
  }
  func.func @transform_9(%arg0: i32) -> (i32, i32) {
    %c0_i32 = arith.constant 0 : i32
    %c0_i32_0 = arith.constant 0 : i32
    %c0_i32_1 = arith.constant 0 : i32
    return %c0_i32, %c0_i32_0 : i32, i32
  }
  func.func @transform_10(%arg0: i32) -> (i32, i32) {
    %c0_i32 = arith.constant 0 : i32
    %c0_i32_0 = arith.constant 0 : i32
    %c0_i32_1 = arith.constant 0 : i32
    return %c0_i32, %c0_i32_0 : i32, i32
  }
  func.func @transform_11(%arg0: i32) -> (i32, i32) {
    %c0_i32 = arith.constant 0 : i32
    %c0_i32_0 = arith.constant 0 : i32
    %c0_i32_1 = arith.constant 0 : i32
    return %c0_i32, %c0_i32_0 : i32, i32
  }
  func.func @transform_12(%arg0: i32) -> (i32, i32) {
    %c0_i32 = arith.constant 0 : i32
    %c0_i32_0 = arith.constant 0 : i32
    %c0_i32_1 = arith.constant 0 : i32
    return %c0_i32, %c0_i32_0 : i32, i32
  }
  func.func @transform_13(%arg0: i32) -> (i32, i32, i32) {
    %c0_i32 = arith.constant 0 : i32
    %c0_i32_0 = arith.constant 0 : i32
    %c0_i32_1 = arith.constant 0 : i32
    return %arg0, %c0_i32, %c0_i32_0 : i32, i32, i32
  }
  func.func @transform_14(%arg0: i32) -> (i32, i32, i32, i32) {
    %c0_i32 = arith.constant 0 : i32
    %c0_i32_0 = arith.constant 0 : i32
    %c0_i32_1 = arith.constant 0 : i32
    %c0_i32_2 = arith.constant 0 : i32
    return %arg0, %c0_i32, %c0_i32_0, %c0_i32_1 : i32, i32, i32, i32
  }
}

module attributes {stable_mosaic.version = 11 : i64} {
  func.func @_block_kernel(%arg0: i32, %arg1: memref<1x8x32xf32, #tpu.memory_space<vmem>>, %arg2: memref<1x32xf32, #tpu.memory_space<vmem>>, %arg3: memref<1x32xf32, #tpu.memory_space<vmem>>, %arg4: memref<32x96xf32, #tpu.memory_space<vmem>>, %arg5: memref<1x96xf32, #tpu.memory_space<vmem>>, %arg6: memref<32x32xf32, #tpu.memory_space<vmem>>, %arg7: memref<1x32xf32, #tpu.memory_space<vmem>>, %arg8: memref<1x32xf32, #tpu.memory_space<vmem>>, %arg9: memref<1x32xf32, #tpu.memory_space<vmem>>, %arg10: memref<32x64xf32, #tpu.memory_space<vmem>>, %arg11: memref<1x64xf32, #tpu.memory_space<vmem>>, %arg12: memref<64x32xf32, #tpu.memory_space<vmem>>, %arg13: memref<1x32xf32, #tpu.memory_space<vmem>>, %arg14: memref<1x8x32xf32, #tpu.memory_space<vmem>>, %arg15: memref<1x4x8x8xf32, #tpu.memory_space<vmem>>, %arg16: memref<1x8x32xf32, #tpu.memory_space<vmem>>) attributes {dimension_semantics = [#tpu.dimension_semantics<parallel>], iteration_bounds = array<i64: 2>, scalar_prefetch = 0 : i64, scratch_operands = 1 : i64, tpu.core_type = #tpu.core_type<tc>, window_params = [{transform_indices = @transform_0, window_bounds = array<i64: 1, 8, 32>}, {pipeline_mode = #tpu.pipeline_mode<synchronous>, transform_indices = @transform_1, window_bounds = array<i64: 1, 32>}, {pipeline_mode = #tpu.pipeline_mode<synchronous>, transform_indices = @transform_2, window_bounds = array<i64: 1, 32>}, {pipeline_mode = #tpu.pipeline_mode<synchronous>, transform_indices = @transform_3, window_bounds = array<i64: 32, 96>}, {pipeline_mode = #tpu.pipeline_mode<synchronous>, transform_indices = @transform_4, window_bounds = array<i64: 1, 96>}, {pipeline_mode = #tpu.pipeline_mode<synchronous>, transform_indices = @transform_5, window_bounds = array<i64: 32, 32>}, {pipeline_mode = #tpu.pipeline_mode<synchronous>, transform_indices = @transform_6, window_bounds = array<i64: 1, 32>}, {pipeline_mode = #tpu.pipeline_mode<synchronous>, transform_indices = @transform_7, window_bounds = array<i64: 1, 32>}, {pipeline_mode = #tpu.pipeline_mode<synchronous>, transform_indices = @transform_8, window_bounds = array<i64: 1, 32>}, {pipeline_mode = #tpu.pipeline_mode<synchronous>, transform_indices = @transform_9, window_bounds = array<i64: 32, 64>}, {pipeline_mode = #tpu.pipeline_mode<synchronous>, transform_indices = @transform_10, window_bounds = array<i64: 1, 64>}, {pipeline_mode = #tpu.pipeline_mode<synchronous>, transform_indices = @transform_11, window_bounds = array<i64: 64, 32>}, {pipeline_mode = #tpu.pipeline_mode<synchronous>, transform_indices = @transform_12, window_bounds = array<i64: 1, 32>}, {transform_indices = @transform_13, window_bounds = array<i64: 1, 8, 32>}, {transform_indices = @transform_14, window_bounds = array<i64: 1, 4, 8, 8>}]} {
    %c0 = arith.constant 0 : index
    %c0_0 = arith.constant 0 : index
    %c0_1 = arith.constant 0 : index
    %0 = vector.load %arg1[%c0, %c0_0, %c0_1] : memref<1x8x32xf32, #tpu.memory_space<vmem>>, vector<1x8x32xf32>
    %1 = vector.shape_cast %0 : vector<1x8x32xf32> to vector<8x32xf32>
    %c0_2 = arith.constant 0 : index
    %c0_3 = arith.constant 0 : index
    %2 = vector.load %arg2[%c0_2, %c0_3] : memref<1x32xf32, #tpu.memory_space<vmem>>, vector<1x32xf32>
    %c0_4 = arith.constant 0 : index
    %c0_5 = arith.constant 0 : index
    %3 = vector.load %arg3[%c0_4, %c0_5] : memref<1x32xf32, #tpu.memory_space<vmem>>, vector<1x32xf32>
    %cst = arith.constant dense<0.000000e+00> : vector<8xf32>
    %4 = vector.multi_reduction <add>, %1, %cst [1] : vector<8x32xf32> to vector<8xf32>
    %5 = vector.shape_cast %4 : vector<8xf32> to vector<8x1xf32>
    %cst_6 = arith.constant 3.200000e+01 : f32
    %6 = vector.broadcast %cst_6 : f32 to vector<8x1xf32>
    %7 = arith.divf %5, %6 : vector<8x1xf32>
    %8 = vector.broadcast %7 : vector<8x1xf32> to vector<8x32xf32>
    %9 = arith.subf %1, %8 : vector<8x32xf32>
    %10 = arith.mulf %9, %9 : vector<8x32xf32>
    %cst_7 = arith.constant dense<0.000000e+00> : vector<8xf32>
    %11 = vector.multi_reduction <add>, %10, %cst_7 [1] : vector<8x32xf32> to vector<8xf32>
    %12 = vector.shape_cast %11 : vector<8xf32> to vector<8x1xf32>
    %cst_8 = arith.constant 3.200000e+01 : f32
    %13 = vector.broadcast %cst_8 : f32 to vector<8x1xf32>
    %14 = arith.divf %12, %13 : vector<8x1xf32>
    %15 = vector.broadcast %7 : vector<8x1xf32> to vector<8x32xf32>
    %16 = arith.subf %1, %15 : vector<8x32xf32>
    %cst_9 = arith.constant 9.99999997E-7 : f32
    %17 = vector.broadcast %cst_9 : f32 to vector<8x1xf32>
    %18 = arith.addf %14, %17 : vector<8x1xf32>
    %19 = math.rsqrt %18 : vector<8x1xf32>
    %20 = vector.broadcast %19 : vector<8x1xf32> to vector<8x32xf32>
    %21 = arith.mulf %16, %20 : vector<8x32xf32>
    %22 = vector.broadcast %2 : vector<1x32xf32> to vector<8x32xf32>
    %23 = arith.mulf %21, %22 : vector<8x32xf32>
    %24 = vector.broadcast %3 : vector<1x32xf32> to vector<8x32xf32>
    %25 = arith.addf %23, %24 : vector<8x32xf32>
    %c0_10 = arith.constant 0 : index
    %c0_11 = arith.constant 0 : index
    %26 = vector.load %arg4[%c0_10, %c0_11] : memref<32x96xf32, #tpu.memory_space<vmem>>, vector<32x96xf32>
    %cst_12 = arith.constant dense<0.000000e+00> : vector<8x96xf32>
    %27 = tpu.matmul %25, %26, %cst_12 {dimension_numbers = #tpu.dot_dimension_numbers<[1], [0], [0], [1], [0, 0, 1, 1], [], []>} : vector<8x32xf32>, vector<32x96xf32>, vector<8x96xf32> -> vector<8x96xf32>
    %c0_13 = arith.constant 0 : index
    %c0_14 = arith.constant 0 : index
    %28 = vector.load %arg5[%c0_13, %c0_14] : memref<1x96xf32, #tpu.memory_space<vmem>>, vector<1x96xf32>
    %29 = vector.broadcast %28 : vector<1x96xf32> to vector<8x96xf32>
    %30 = arith.addf %27, %29 : vector<8x96xf32>
    %31 = vector.shape_cast %30 : vector<8x96xf32> to vector<1x8x96xf32>
    %32 = vector.extract_strided_slice %31 {offsets = [0, 0, 0], sizes = [1, 8, 8], strides = [1, 1, 1]} : vector<1x8x96xf32> to vector<1x8x8xf32>
    %33 = vector.extract_strided_slice %31 {offsets = [0, 0, 32], sizes = [1, 8, 8], strides = [1, 1, 1]} : vector<1x8x96xf32> to vector<1x8x8xf32>
    %34 = vector.extract_strided_slice %31 {offsets = [0, 0, 64], sizes = [1, 8, 8], strides = [1, 1, 1]} : vector<1x8x96xf32> to vector<1x8x8xf32>
    "tpu.trace_start"() <{level = 10 : i32, message = "bqd,bkd->bqk"}> : () -> ()
    %cst_15 = arith.constant dense<0.000000e+00> : vector<1x8x8xf32>
    %35 = tpu.matmul %32, %33, %cst_15 {dimension_numbers = #tpu.dot_dimension_numbers<[2], [2], [1], [1], [0, 0, 0, 1, 1, 1], [0], [0]>} : vector<1x8x8xf32>, vector<1x8x8xf32>, vector<1x8x8xf32> -> vector<1x8x8xf32>
    "tpu.trace_stop"() : () -> ()
    %cst_16 = arith.constant 0.353553385 : f32
    %36 = vector.broadcast %cst_16 : f32 to vector<1x8x8xf32>
    %37 = arith.mulf %35, %36 : vector<1x8x8xf32>
    %cst_17 = arith.constant dense<0xFF800000> : vector<1x8xf32>
    %38 = vector.multi_reduction <maximumf>, %37, %cst_17 [2] : vector<1x8x8xf32> to vector<1x8xf32>
    %39 = vector.shape_cast %38 : vector<1x8xf32> to vector<1x8x1xf32>
    %40 = vector.broadcast %39 : vector<1x8x1xf32> to vector<1x8x8xf32>
    %41 = arith.subf %37, %40 : vector<1x8x8xf32>
    %42 = math.exp %41 : vector<1x8x8xf32>
    %cst_18 = arith.constant dense<0.000000e+00> : vector<1x8xf32>
    %43 = vector.multi_reduction <add>, %42, %cst_18 [2] : vector<1x8x8xf32> to vector<1x8xf32>
    %44 = vector.shape_cast %43 : vector<1x8xf32> to vector<1x8x1xf32>
    %45 = vector.broadcast %44 : vector<1x8x1xf32> to vector<1x8x8xf32>
    %46 = arith.divf %42, %45 : vector<1x8x8xf32>
    %c0_19 = arith.constant 0 : index
    %c0_20 = arith.constant 0 : index
    %c0_21 = arith.constant 0 : index
    %c0_22 = arith.constant 0 : index
    %47 = vector.load %arg15[%c0_19, %c0_20, %c0_21, %c0_22] : memref<1x4x8x8xf32, #tpu.memory_space<vmem>>, vector<1x1x8x8xf32>
    %48 = vector.shape_cast %47 : vector<1x1x8x8xf32> to vector<1x8x8xf32>
    %49 = vector.shape_cast %46 : vector<1x8x8xf32> to vector<1x1x8x8xf32>
    tpu.vector_store %arg15[%c0_19, %c0_20, %c0_21, %c0_22], %49 {strides = array<i32>} : memref<1x4x8x8xf32, #tpu.memory_space<vmem>>, vector<1x1x8x8xf32>,
    "tpu.trace_start"() <{level = 10 : i32, message = "bqk,bkd->bqd"}> : () -> ()
    %cst_23 = arith.constant dense<0.000000e+00> : vector<1x8x8xf32>
    %50 = tpu.matmul %46, %34, %cst_23 {dimension_numbers = #tpu.dot_dimension_numbers<[2], [1], [1], [2], [0, 0, 0, 1, 1, 2], [0], [0]>} : vector<1x8x8xf32>, vector<1x8x8xf32>, vector<1x8x8xf32> -> vector<1x8x8xf32>
    "tpu.trace_stop"() : () -> ()
    %c0_24 = arith.constant 0 : index
    %c0_25 = arith.constant 0 : index
    %c0_26 = arith.constant 0 : index
    %51 = vector.load %arg16[%c0_24, %c0_25, %c0_26] : memref<1x8x32xf32, #tpu.memory_space<vmem>>, vector<1x8x8xf32>
    tpu.vector_store %arg16[%c0_24, %c0_25, %c0_26], %50 {strides = array<i32>} : memref<1x8x32xf32, #tpu.memory_space<vmem>>, vector<1x8x8xf32>,
    %52 = vector.extract_strided_slice %31 {offsets = [0, 0, 8], sizes = [1, 8, 8], strides = [1, 1, 1]} : vector<1x8x96xf32> to vector<1x8x8xf32>
    %53 = vector.extract_strided_slice %31 {offsets = [0, 0, 40], sizes = [1, 8, 8], strides = [1, 1, 1]} : vector<1x8x96xf32> to vector<1x8x8xf32>
    %54 = vector.extract_strided_slice %31 {offsets = [0, 0, 72], sizes = [1, 8, 8], strides = [1, 1, 1]} : vector<1x8x96xf32> to vector<1x8x8xf32>
    "tpu.trace_start"() <{level = 10 : i32, message = "bqd,bkd->bqk"}> : () -> ()
    %cst_27 = arith.constant dense<0.000000e+00> : vector<1x8x8xf32>
    %55 = tpu.matmul %52, %53, %cst_27 {dimension_numbers = #tpu.dot_dimension_numbers<[2], [2], [1], [1], [0, 0, 0, 1, 1, 1], [0], [0]>} : vector<1x8x8xf32>, vector<1x8x8xf32>, vector<1x8x8xf32> -> vector<1x8x8xf32>
    "tpu.trace_stop"() : () -> ()
    %cst_28 = arith.constant 0.353553385 : f32
    %56 = vector.broadcast %cst_28 : f32 to vector<1x8x8xf32>
    %57 = arith.mulf %55, %56 : vector<1x8x8xf32>
    %cst_29 = arith.constant dense<0xFF800000> : vector<1x8xf32>
    %58 = vector.multi_reduction <maximumf>, %57, %cst_29 [2] : vector<1x8x8xf32> to vector<1x8xf32>
    %59 = vector.shape_cast %58 : vector<1x8xf32> to vector<1x8x1xf32>
    %60 = vector.broadcast %59 : vector<1x8x1xf32> to vector<1x8x8xf32>
    %61 = arith.subf %57, %60 : vector<1x8x8xf32>
    %62 = math.exp %61 : vector<1x8x8xf32>
    %cst_30 = arith.constant dense<0.000000e+00> : vector<1x8xf32>
    %63 = vector.multi_reduction <add>, %62, %cst_30 [2] : vector<1x8x8xf32> to vector<1x8xf32>
    %64 = vector.shape_cast %63 : vector<1x8xf32> to vector<1x8x1xf32>
    %65 = vector.broadcast %64 : vector<1x8x1xf32> to vector<1x8x8xf32>
    %66 = arith.divf %62, %65 : vector<1x8x8xf32>
    %c0_31 = arith.constant 0 : index
    %c1 = arith.constant 1 : index
    %c0_32 = arith.constant 0 : index
    %c0_33 = arith.constant 0 : index
    %67 = vector.load %arg15[%c0_31, %c1, %c0_32, %c0_33] : memref<1x4x8x8xf32, #tpu.memory_space<vmem>>, vector<1x1x8x8xf32>
    %68 = vector.shape_cast %67 : vector<1x1x8x8xf32> to vector<1x8x8xf32>
    %69 = vector.shape_cast %66 : vector<1x8x8xf32> to vector<1x1x8x8xf32>
    tpu.vector_store %arg15[%c0_31, %c1, %c0_32, %c0_33], %69 {strides = array<i32>} : memref<1x4x8x8xf32, #tpu.memory_space<vmem>>, vector<1x1x8x8xf32>,
    "tpu.trace_start"() <{level = 10 : i32, message = "bqk,bkd->bqd"}> : () -> ()
    %cst_34 = arith.constant dense<0.000000e+00> : vector<1x8x8xf32>
    %70 = tpu.matmul %66, %54, %cst_34 {dimension_numbers = #tpu.dot_dimension_numbers<[2], [1], [1], [2], [0, 0, 0, 1, 1, 2], [0], [0]>} : vector<1x8x8xf32>, vector<1x8x8xf32>, vector<1x8x8xf32> -> vector<1x8x8xf32>
    "tpu.trace_stop"() : () -> ()
    %c0_35 = arith.constant 0 : index
    %c0_36 = arith.constant 0 : index
    %c8 = arith.constant 8 : index
    %71 = vector.load %arg16[%c0_35, %c0_36, %c8] : memref<1x8x32xf32, #tpu.memory_space<vmem>>, vector<1x8x8xf32>
    tpu.vector_store %arg16[%c0_35, %c0_36, %c8], %70 {strides = array<i32>} : memref<1x8x32xf32, #tpu.memory_space<vmem>>, vector<1x8x8xf32>,
    %72 = vector.extract_strided_slice %31 {offsets = [0, 0, 16], sizes = [1, 8, 8], strides = [1, 1, 1]} : vector<1x8x96xf32> to vector<1x8x8xf32>
    %73 = vector.extract_strided_slice %31 {offsets = [0, 0, 48], sizes = [1, 8, 8], strides = [1, 1, 1]} : vector<1x8x96xf32> to vector<1x8x8xf32>
    %74 = vector.extract_strided_slice %31 {offsets = [0, 0, 80], sizes = [1, 8, 8], strides = [1, 1, 1]} : vector<1x8x96xf32> to vector<1x8x8xf32>
    "tpu.trace_start"() <{level = 10 : i32, message = "bqd,bkd->bqk"}> : () -> ()
    %cst_37 = arith.constant dense<0.000000e+00> : vector<1x8x8xf32>
    %75 = tpu.matmul %72, %73, %cst_37 {dimension_numbers = #tpu.dot_dimension_numbers<[2], [2], [1], [1], [0, 0, 0, 1, 1, 1], [0], [0]>} : vector<1x8x8xf32>, vector<1x8x8xf32>, vector<1x8x8xf32> -> vector<1x8x8xf32>
    "tpu.trace_stop"() : () -> ()
    %cst_38 = arith.constant 0.353553385 : f32
    %76 = vector.broadcast %cst_38 : f32 to vector<1x8x8xf32>
    %77 = arith.mulf %75, %76 : vector<1x8x8xf32>
    %cst_39 = arith.constant dense<0xFF800000> : vector<1x8xf32>
    %78 = vector.multi_reduction <maximumf>, %77, %cst_39 [2] : vector<1x8x8xf32> to vector<1x8xf32>
    %79 = vector.shape_cast %78 : vector<1x8xf32> to vector<1x8x1xf32>
    %80 = vector.broadcast %79 : vector<1x8x1xf32> to vector<1x8x8xf32>
    %81 = arith.subf %77, %80 : vector<1x8x8xf32>
    %82 = math.exp %81 : vector<1x8x8xf32>
    %cst_40 = arith.constant dense<0.000000e+00> : vector<1x8xf32>
    %83 = vector.multi_reduction <add>, %82, %cst_40 [2] : vector<1x8x8xf32> to vector<1x8xf32>
    %84 = vector.shape_cast %83 : vector<1x8xf32> to vector<1x8x1xf32>
    %85 = vector.broadcast %84 : vector<1x8x1xf32> to vector<1x8x8xf32>
    %86 = arith.divf %82, %85 : vector<1x8x8xf32>
    %c0_41 = arith.constant 0 : index
    %c2 = arith.constant 2 : index
    %c0_42 = arith.constant 0 : index
    %c0_43 = arith.constant 0 : index
    %87 = vector.load %arg15[%c0_41, %c2, %c0_42, %c0_43] : memref<1x4x8x8xf32, #tpu.memory_space<vmem>>, vector<1x1x8x8xf32>
    %88 = vector.shape_cast %87 : vector<1x1x8x8xf32> to vector<1x8x8xf32>
    %89 = vector.shape_cast %86 : vector<1x8x8xf32> to vector<1x1x8x8xf32>
    tpu.vector_store %arg15[%c0_41, %c2, %c0_42, %c0_43], %89 {strides = array<i32>} : memref<1x4x8x8xf32, #tpu.memory_space<vmem>>, vector<1x1x8x8xf32>,
    "tpu.trace_start"() <{level = 10 : i32, message = "bqk,bkd->bqd"}> : () -> ()
    %cst_44 = arith.constant dense<0.000000e+00> : vector<1x8x8xf32>
    %90 = tpu.matmul %86, %74, %cst_44 {dimension_numbers = #tpu.dot_dimension_numbers<[2], [1], [1], [2], [0, 0, 0, 1, 1, 2], [0], [0]>} : vector<1x8x8xf32>, vector<1x8x8xf32>, vector<1x8x8xf32> -> vector<1x8x8xf32>
    "tpu.trace_stop"() : () -> ()
    %c0_45 = arith.constant 0 : index
    %c0_46 = arith.constant 0 : index
    %c16 = arith.constant 16 : index
    %91 = vector.load %arg16[%c0_45, %c0_46, %c16] : memref<1x8x32xf32, #tpu.memory_space<vmem>>, vector<1x8x8xf32>
    tpu.vector_store %arg16[%c0_45, %c0_46, %c16], %90 {strides = array<i32>} : memref<1x8x32xf32, #tpu.memory_space<vmem>>, vector<1x8x8xf32>,
    %92 = vector.extract_strided_slice %31 {offsets = [0, 0, 24], sizes = [1, 8, 8], strides = [1, 1, 1]} : vector<1x8x96xf32> to vector<1x8x8xf32>
    %93 = vector.extract_strided_slice %31 {offsets = [0, 0, 56], sizes = [1, 8, 8], strides = [1, 1, 1]} : vector<1x8x96xf32> to vector<1x8x8xf32>
    %94 = vector.extract_strided_slice %31 {offsets = [0, 0, 88], sizes = [1, 8, 8], strides = [1, 1, 1]} : vector<1x8x96xf32> to vector<1x8x8xf32>
    "tpu.trace_start"() <{level = 10 : i32, message = "bqd,bkd->bqk"}> : () -> ()
    %cst_47 = arith.constant dense<0.000000e+00> : vector<1x8x8xf32>
    %95 = tpu.matmul %92, %93, %cst_47 {dimension_numbers = #tpu.dot_dimension_numbers<[2], [2], [1], [1], [0, 0, 0, 1, 1, 1], [0], [0]>} : vector<1x8x8xf32>, vector<1x8x8xf32>, vector<1x8x8xf32> -> vector<1x8x8xf32>
    "tpu.trace_stop"() : () -> ()
    %cst_48 = arith.constant 0.353553385 : f32
    %96 = vector.broadcast %cst_48 : f32 to vector<1x8x8xf32>
    %97 = arith.mulf %95, %96 : vector<1x8x8xf32>
    %cst_49 = arith.constant dense<0xFF800000> : vector<1x8xf32>
    %98 = vector.multi_reduction <maximumf>, %97, %cst_49 [2] : vector<1x8x8xf32> to vector<1x8xf32>
    %99 = vector.shape_cast %98 : vector<1x8xf32> to vector<1x8x1xf32>
    %100 = vector.broadcast %99 : vector<1x8x1xf32> to vector<1x8x8xf32>
    %101 = arith.subf %97, %100 : vector<1x8x8xf32>
    %102 = math.exp %101 : vector<1x8x8xf32>
    %cst_50 = arith.constant dense<0.000000e+00> : vector<1x8xf32>
    %103 = vector.multi_reduction <add>, %102, %cst_50 [2] : vector<1x8x8xf32> to vector<1x8xf32>
    %104 = vector.shape_cast %103 : vector<1x8xf32> to vector<1x8x1xf32>
    %105 = vector.broadcast %104 : vector<1x8x1xf32> to vector<1x8x8xf32>
    %106 = arith.divf %102, %105 : vector<1x8x8xf32>
    %c0_51 = arith.constant 0 : index
    %c3 = arith.constant 3 : index
    %c0_52 = arith.constant 0 : index
    %c0_53 = arith.constant 0 : index
    %107 = vector.load %arg15[%c0_51, %c3, %c0_52, %c0_53] : memref<1x4x8x8xf32, #tpu.memory_space<vmem>>, vector<1x1x8x8xf32>
    %108 = vector.shape_cast %107 : vector<1x1x8x8xf32> to vector<1x8x8xf32>
    %109 = vector.shape_cast %106 : vector<1x8x8xf32> to vector<1x1x8x8xf32>
    tpu.vector_store %arg15[%c0_51, %c3, %c0_52, %c0_53], %109 {strides = array<i32>} : memref<1x4x8x8xf32, #tpu.memory_space<vmem>>, vector<1x1x8x8xf32>,
    "tpu.trace_start"() <{level = 10 : i32, message = "bqk,bkd->bqd"}> : () -> ()
    %cst_54 = arith.constant dense<0.000000e+00> : vector<1x8x8xf32>
    %110 = tpu.matmul %106, %94, %cst_54 {dimension_numbers = #tpu.dot_dimension_numbers<[2], [1], [1], [2], [0, 0, 0, 1, 1, 2], [0], [0]>} : vector<1x8x8xf32>, vector<1x8x8xf32>, vector<1x8x8xf32> -> vector<1x8x8xf32>
    "tpu.trace_stop"() : () -> ()
    %c0_55 = arith.constant 0 : index
    %c0_56 = arith.constant 0 : index
    %c24 = arith.constant 24 : index
    %111 = vector.load %arg16[%c0_55, %c0_56, %c24] : memref<1x8x32xf32, #tpu.memory_space<vmem>>, vector<1x8x8xf32>
    tpu.vector_store %arg16[%c0_55, %c0_56, %c24], %110 {strides = array<i32>} : memref<1x8x32xf32, #tpu.memory_space<vmem>>, vector<1x8x8xf32>,
    %c0_57 = arith.constant 0 : index
    %c0_58 = arith.constant 0 : index
    %c0_59 = arith.constant 0 : index
    %112 = vector.load %arg16[%c0_57, %c0_58, %c0_59] : memref<1x8x32xf32, #tpu.memory_space<vmem>>, vector<1x8x32xf32>
    %113 = vector.shape_cast %112 : vector<1x8x32xf32> to vector<8x32xf32>
    %c0_60 = arith.constant 0 : index
    %c0_61 = arith.constant 0 : index
    %114 = vector.load %arg6[%c0_60, %c0_61] : memref<32x32xf32, #tpu.memory_space<vmem>>, vector<32x32xf32>
    %cst_62 = arith.constant dense<0.000000e+00> : vector<8x32xf32>
    %115 = tpu.matmul %113, %114, %cst_62 {dimension_numbers = #tpu.dot_dimension_numbers<[1], [0], [0], [1], [0, 0, 1, 1], [], []>} : vector<8x32xf32>, vector<32x32xf32>, vector<8x32xf32> -> vector<8x32xf32>
    %c0_63 = arith.constant 0 : index
    %c0_64 = arith.constant 0 : index
    %116 = vector.load %arg7[%c0_63, %c0_64] : memref<1x32xf32, #tpu.memory_space<vmem>>, vector<1x32xf32>
    %117 = vector.broadcast %116 : vector<1x32xf32> to vector<8x32xf32>
    %118 = arith.addf %115, %117 : vector<8x32xf32>
    %119 = arith.addf %118, %1 : vector<8x32xf32>
    %c0_65 = arith.constant 0 : index
    %c0_66 = arith.constant 0 : index
    %120 = vector.load %arg8[%c0_65, %c0_66] : memref<1x32xf32, #tpu.memory_space<vmem>>, vector<1x32xf32>
    %c0_67 = arith.constant 0 : index
    %c0_68 = arith.constant 0 : index
    %121 = vector.load %arg9[%c0_67, %c0_68] : memref<1x32xf32, #tpu.memory_space<vmem>>, vector<1x32xf32>
    %cst_69 = arith.constant dense<0.000000e+00> : vector<8xf32>
    %122 = vector.multi_reduction <add>, %119, %cst_69 [1] : vector<8x32xf32> to vector<8xf32>
    %123 = vector.shape_cast %122 : vector<8xf32> to vector<8x1xf32>
    %cst_70 = arith.constant 3.200000e+01 : f32
    %124 = vector.broadcast %cst_70 : f32 to vector<8x1xf32>
    %125 = arith.divf %123, %124 : vector<8x1xf32>
    %126 = vector.broadcast %125 : vector<8x1xf32> to vector<8x32xf32>
    %127 = arith.subf %119, %126 : vector<8x32xf32>
    %128 = arith.mulf %127, %127 : vector<8x32xf32>
    %cst_71 = arith.constant dense<0.000000e+00> : vector<8xf32>
    %129 = vector.multi_reduction <add>, %128, %cst_71 [1] : vector<8x32xf32> to vector<8xf32>
    %130 = vector.shape_cast %129 : vector<8xf32> to vector<8x1xf32>
    %cst_72 = arith.constant 3.200000e+01 : f32
    %131 = vector.broadcast %cst_72 : f32 to vector<8x1xf32>
    %132 = arith.divf %130, %131 : vector<8x1xf32>
    %133 = vector.broadcast %125 : vector<8x1xf32> to vector<8x32xf32>
    %134 = arith.subf %119, %133 : vector<8x32xf32>
    %cst_73 = arith.constant 9.99999997E-7 : f32
    %135 = vector.broadcast %cst_73 : f32 to vector<8x1xf32>
    %136 = arith.addf %132, %135 : vector<8x1xf32>
    %137 = math.rsqrt %136 : vector<8x1xf32>
    %138 = vector.broadcast %137 : vector<8x1xf32> to vector<8x32xf32>
    %139 = arith.mulf %134, %138 : vector<8x32xf32>
    %140 = vector.broadcast %120 : vector<1x32xf32> to vector<8x32xf32>
    %141 = arith.mulf %139, %140 : vector<8x32xf32>
    %142 = vector.broadcast %121 : vector<1x32xf32> to vector<8x32xf32>
    %143 = arith.addf %141, %142 : vector<8x32xf32>
    %cst_74 = arith.constant 0.000000e+00 : f32
    %144 = vector.broadcast %cst_74 : f32 to vector<8x32xf32>
    %c0_75 = arith.constant 0 : index
    %c0_76 = arith.constant 0 : index
    %145 = vector.load %arg10[%c0_75, %c0_76] : memref<32x64xf32, #tpu.memory_space<vmem>>, vector<32x64xf32>
    %cst_77 = arith.constant dense<0.000000e+00> : vector<8x64xf32>
    %146 = tpu.matmul %143, %145, %cst_77 {dimension_numbers = #tpu.dot_dimension_numbers<[1], [0], [0], [1], [0, 0, 1, 1], [], []>} : vector<8x32xf32>, vector<32x64xf32>, vector<8x64xf32> -> vector<8x64xf32>
    %c0_78 = arith.constant 0 : index
    %c0_79 = arith.constant 0 : index
    %147 = vector.load %arg11[%c0_78, %c0_79] : memref<1x64xf32, #tpu.memory_space<vmem>>, vector<1x64xf32>
    %148 = vector.broadcast %147 : vector<1x64xf32> to vector<8x64xf32>
    %149 = arith.addf %146, %148 : vector<8x64xf32>
    %cst_80 = arith.constant 5.000000e-01 : f32
    %150 = vector.broadcast %cst_80 : f32 to vector<8x64xf32>
    %151 = arith.mulf %150, %149 : vector<8x64xf32>
    %cst_81 = arith.constant 0.707106769 : f32
    %152 = vector.broadcast %cst_81 : f32 to vector<8x64xf32>
    %153 = arith.mulf %149, %152 : vector<8x64xf32>
    %154 = math.erf %153 : vector<8x64xf32>
    %cst_82 = arith.constant 1.000000e+00 : f32
    %155 = vector.broadcast %cst_82 : f32 to vector<8x64xf32>
    %156 = arith.addf %155, %154 : vector<8x64xf32>
    %157 = arith.mulf %151, %156 : vector<8x64xf32>
    %c0_83 = arith.constant 0 : index
    %c0_84 = arith.constant 0 : index
    %158 = vector.load %arg12[%c0_83, %c0_84] : memref<64x32xf32, #tpu.memory_space<vmem>>, vector<64x32xf32>
    %cst_85 = arith.constant dense<0.000000e+00> : vector<8x32xf32>
    %159 = tpu.matmul %157, %158, %cst_85 {dimension_numbers = #tpu.dot_dimension_numbers<[1], [0], [0], [1], [0, 0, 1, 1], [], []>} : vector<8x64xf32>, vector<64x32xf32>, vector<8x32xf32> -> vector<8x32xf32>
    %160 = arith.addf %144, %159 : vector<8x32xf32>
    %c0_86 = arith.constant 0 : index
    %c0_87 = arith.constant 0 : index
    %161 = vector.load %arg13[%c0_86, %c0_87] : memref<1x32xf32, #tpu.memory_space<vmem>>, vector<1x32xf32>
    %162 = vector.broadcast %161 : vector<1x32xf32> to vector<8x32xf32>
    %163 = arith.addf %160, %162 : vector<8x32xf32>
    %164 = arith.addf %163, %119 : vector<8x32xf32>
    %165 = vector.shape_cast %164 : vector<8x32xf32> to vector<1x8x32xf32>
    %c0_88 = arith.constant 0 : index
    %c0_89 = arith.constant 0 : index
    %c0_90 = arith.constant 0 : index
    %166 = vector.load %arg14[%c0_88, %c0_89, %c0_90] : memref<1x8x32xf32, #tpu.memory_space<vmem>>, vector<1x8x32xf32>
    tpu.vector_store %arg14[%c0_88, %c0_89, %c0_90], %165 {strides = array<i32>} : memref<1x8x32xf32, #tpu.memory_space<vmem>>, vector<1x8x32xf32>,
    return
  }
  func.func @transform_0(%arg0: i32) -> (i32, i32, i32) {
    %c0_i32 = arith.constant 0 : i32
    %c0_i32_0 = arith.constant 0 : i32
    %c0_i32_1 = arith.constant 0 : i32
    return %arg0, %c0_i32, %c0_i32_0 : i32, i32, i32
  }
  func.func @transform_1(%arg0: i32) -> (i32, i32) {
    %c0_i32 = arith.constant 0 : i32
    %c0_i32_0 = arith.constant 0 : i32
    %c0_i32_1 = arith.constant 0 : i32
    return %c0_i32, %c0_i32_0 : i32, i32
  }
  func.func @transform_2(%arg0: i32) -> (i32, i32) {
    %c0_i32 = arith.constant 0 : i32
    %c0_i32_0 = arith.constant 0 : i32
    %c0_i32_1 = arith.constant 0 : i32
    return %c0_i32, %c0_i32_0 : i32, i32
  }
  func.func @transform_3(%arg0: i32) -> (i32, i32) {
    %c0_i32 = arith.constant 0 : i32
    %c0_i32_0 = arith.constant 0 : i32
    %c0_i32_1 = arith.constant 0 : i32
    return %c0_i32, %c0_i32_0 : i32, i32
  }
  func.func @transform_4(%arg0: i32) -> (i32, i32) {
    %c0_i32 = arith.constant 0 : i32
    %c0_i32_0 = arith.constant 0 : i32
    %c0_i32_1 = arith.constant 0 : i32
    return %c0_i32, %c0_i32_0 : i32, i32
  }
  func.func @transform_5(%arg0: i32) -> (i32, i32) {
    %c0_i32 = arith.constant 0 : i32
    %c0_i32_0 = arith.constant 0 : i32
    %c0_i32_1 = arith.constant 0 : i32
    return %c0_i32, %c0_i32_0 : i32, i32
  }
  func.func @transform_6(%arg0: i32) -> (i32, i32) {
    %c0_i32 = arith.constant 0 : i32
    %c0_i32_0 = arith.constant 0 : i32
    %c0_i32_1 = arith.constant 0 : i32
    return %c0_i32, %c0_i32_0 : i32, i32
  }
  func.func @transform_7(%arg0: i32) -> (i32, i32) {
    %c0_i32 = arith.constant 0 : i32
    %c0_i32_0 = arith.constant 0 : i32
    %c0_i32_1 = arith.constant 0 : i32
    return %c0_i32, %c0_i32_0 : i32, i32
  }
  func.func @transform_8(%arg0: i32) -> (i32, i32) {
    %c0_i32 = arith.constant 0 : i32
    %c0_i32_0 = arith.constant 0 : i32
    %c0_i32_1 = arith.constant 0 : i32
    return %c0_i32, %c0_i32_0 : i32, i32
  }
  func.func @transform_9(%arg0: i32) -> (i32, i32) {
    %c0_i32 = arith.constant 0 : i32
    %c0_i32_0 = arith.constant 0 : i32
    %c0_i32_1 = arith.constant 0 : i32
    return %c0_i32, %c0_i32_0 : i32, i32
  }
  func.func @transform_10(%arg0: i32) -> (i32, i32) {
    %c0_i32 = arith.constant 0 : i32
    %c0_i32_0 = arith.constant 0 : i32
    %c0_i32_1 = arith.constant 0 : i32
    return %c0_i32, %c0_i32_0 : i32, i32
  }
  func.func @transform_11(%arg0: i32) -> (i32, i32) {
    %c0_i32 = arith.constant 0 : i32
    %c0_i32_0 = arith.constant 0 : i32
    %c0_i32_1 = arith.constant 0 : i32
    return %c0_i32, %c0_i32_0 : i32, i32
  }
  func.func @transform_12(%arg0: i32) -> (i32, i32) {
    %c0_i32 = arith.constant 0 : i32
    %c0_i32_0 = arith.constant 0 : i32
    %c0_i32_1 = arith.constant 0 : i32
    return %c0_i32, %c0_i32_0 : i32, i32
  }
  func.func @transform_13(%arg0: i32) -> (i32, i32, i32) {
    %c0_i32 = arith.constant 0 : i32
    %c0_i32_0 = arith.constant 0 : i32
    %c0_i32_1 = arith.constant 0 : i32
    return %arg0, %c0_i32, %c0_i32_0 : i32, i32, i32
  }
  func.func @transform_14(%arg0: i32) -> (i32, i32, i32, i32) {
    %c0_i32 = arith.constant 0 : i32
    %c0_i32_0 = arith.constant 0 : i32
    %c0_i32_1 = arith.constant 0 : i32
    %c0_i32_2 = arith.constant 0 : i32
    return %arg0, %c0_i32, %c0_i32_0, %c0_i32_1 : i32, i32, i32, i32
  }
}

</mosaic_0001>

<bundles_post_ra>
// kernel: tpu_custom_call.1
= control target key start
LH: loop header
LB: loop body
LE: loop exit
PB: predicated region body
PF: predicated region fallthrough
CT: control target
= control target key end

     0   :  { %s2596_s0 = inlined_call_operand.hbm [shape: f32[2,8,32], index: 0, kind: input, shape index: {}]   ;;  %s2597_s1 = inlined_call_operand.vmem [shape: f32[1,32], index: 1, kind: input, shape index: {}]   ;;  %s2598_s2 = inlined_call_operand.vmem [shape: f32[1,32], index: 2, kind: input, shape index: {}]   ;;  %s2599_s3 = inlined_call_operand.vmem [shape: f32[32,96], index: 3, kind: input, shape index: {}]   ;;  %s2600_s4 = inlined_call_operand.vmem [shape: f32[1,96], index: 4, kind: input, shape index: {}]   ;;  %s2601_s5 = inlined_call_operand.vmem [shape: f32[32,32], index: 5, kind: input, shape index: {}]   ;;  %s2602_s6 = inlined_call_operand.vmem [shape: f32[1,32], index: 6, kind: input, shape index: {}]   ;;  %s2603_s7 = inlined_call_operand.vmem [shape: f32[1,32], index: 7, kind: input, shape index: {}]   ;;  %s2604_s8 = inlined_call_operand.vmem [shape: f32[1,32], index: 8, kind: input, shape index: {}]   ;;  %s2605_s9 = inlined_call_operand.vmem [shape: f32[32,64], index: 9, kind: input, shape index: {}]   ;;  %s2606_s10 = inlined_call_operand.vmem [shape: f32[1,64], index: 10, kind: input, shape index: {}]   ;;  %s2607_s11 = inlined_call_operand.vmem [shape: f32[64,32], index: 11, kind: input, shape index: {}]   ;;  %s2608_s12 = inlined_call_operand.vmem [shape: f32[1,32], index: 12, kind: input, shape index: {}]   ;;  %s2609_s13 = inlined_call_operand.hbm [shape: f32[2,8,32], index: 13, kind: output, shape index: {0}]   ;;  %s2610_s14 = inlined_call_operand.hbm [shape: f32[2,4,8,8], index: 14, kind: output, shape index: {1}]  }
   0x1   :  { %2620 = sst [smem:[#allocation17_spill]] %s2596_s0 }
   0x2   :  { %2621 = sst [smem:[#allocation18_spill]] %s2597_s1 }
   0x3   :  { %2622 = sst [smem:[#allocation19_spill]] %s2598_s2 }
   0x4   :  { %2623 = sst [smem:[#allocation20_spill]] %s2608_s12 }
   0x5   :  { %2624 = sst [smem:[#allocation21_spill]] %s2609_s13 }
   0x6   :  { %20 = vsyncpa [#allocation4], 0 }
   0x7   :  { %22 = vsyncpa [#allocation4 + $0x1], 0 }
   0x8   :  { %23 = vsyncpa [#allocation5], 0 }
   0x9   :  { %25 = vsyncpa [#allocation5 + $0x1], 0 }
   0xa   :  { %26 = vsyncpa [#allocation8], 0 }
   0xb   :  { %28 = vsyncpa [#allocation8 + $0x1], 0  ;;  %s2217_s29 = smov 0   ;;  %s2219_s30 = smov 0  }
   0xc   :  { %s2221_s15 = smov 0   ;;  %s2223_s16 = smov 0  }
   0xd LB: > { %2625 = sst [smem:[#allocation12_spill]] %s2108_s29  ;;  %s2238_s17 = sadd.s32 4294967295, %s2120_s16   ;;  %s2120_s16 = sphi %s2223_s16, %s2649_s16   ;;  %s2116_s15 = sphi %s2221_s15, %s2651_s15   ;;  %s2112_s30 = sphi %s2219_s30, %s2653_s30   ;;  %s2108_s29 = sphi %s2217_s29, %s2652_s29  }
   0xe   : > { %2626 = sst [smem:[#allocation13_spill]] %s2116_s15  ;;  %s1732_s18 = sadd.s32 4294967294, %s2120_s16  }
   0xf   : > { %s2242_s19 = sadd.s32 1, %s2120_s16   ;;  %s41_s20 = sadd.s32 1, %s2116_s15 }
  0x10   : > { %2627 = sst [smem:[#allocation14_spill]] %s2242_s19  ;;  %s38_s21 = ssub.s32 %s2120_s16, %s2242_s19 }
  0x11   : > { %p48_p0 = scmp.ne.s32.totalorder %s2116_s15, %s2112_s30  ;;  %p39_p1 = scmp.eq.s32.totalorder %s38_s21, 0 }
  0x12   : > { %p49_p2 = scmp.eq.s32.totalorder %s2120_s16, 0  ;;  %p54_p3 = scmp.ne.s32.totalorder %s2112_s30, %s2108_s29 }
  0x13   : > { %p55_p4 = scmp.eq.s32.totalorder %s2238_s17, 0  ;;  %p330_p7 = scmp.eq.s32.totalorder %s2238_s17, 1 }
  0x14   : > { %s2254_s22 = scalar_select %p39_p1, %s2116_s15, %s41_s20  }
  0x15   : > { %p2256_p5 = por %p49_p2, %p48_p0  ;;  %p2260_p6 = por %p55_p4, %p54_p3 }
  0x16   : > { %2628 = sst [smem:[#allocation15_spill]] %s2254_s22  ;;  %p336_p8 = scmp.eq.s32.totalorder %s1732_s18, 1 }
  0x17   : > { %s2630_s24 = scalar_select %p2260_p6, 1, 0 }
  0x18   : > { %p1925_p10 = scmp.lt.s32.totalorder %s2120_s16, 2  ;;  %p2267_p11 = por %p330_p7, %p48_p0 }
  0x19   : > { %p2271_p12 = por %p336_p8, %p54_p3  ;;  %s418_s27 = sand.u32 1, %s2116_s15  }
  0x1a   : > { %s2631_s25 = scalar_select %p2267_p11, 1, 0 }
  0x1b   : > { %s2632_s26 = scalar_select %p2271_p12, 1, 0 }
  0x1c   : > { %s1736_s28 = sshll.u32 %s2120_s16, 7  ;;  %s1735_s20 = sshll.u32 %s418_s27, 3 }
  0x1d   : > { %2633 = sst [smem:[#allocation16_spill]] %s2632_s26  ;;  %s422_s18 = scalar_lea.vmem [#allocation3], %s1735_s20 }
  0x1e   : > { %s2634_s0 = sld [smem:[#allocation17_spill]]  ;;  %s429_s29 = sshll.u32 %s422_s18, 4  ;;  %s2288_s29 = int_to_ptr.vmem [resolvable:$true] %s429_s29 }
  0x1f   : > { %p2284_p13 = pnand %p1925_p10, %p2256_p5  ;;  %s419_s15 = scalar_lea.sflag [#allocation4], %s418_s27 }
  0x21   : > { %p2000_p3 = pneg %p2284_p13 }
  0x24   : > { %s2280_s19 = scalar_lea.hbm %s2634_s0, %s1736_s28  ;;  %s2003_s23 = scalar_lea.hbm %s2634_s0, 256 }
  0x25   : > { %s1998_s26 = scalar_lea.hbm %s2280_s19, 128  ;;  %p2004_p5 = scmp.lt.s32.totalorder %s2280_s19, %s2634_s0 }
  0x26   : > { %p1999_p2 = scmp.ne.s32.totalorder %s2280_s19, %s1998_s26  ;;  %p2005_p8 = scmp.lt.s32.totalorder %s2003_s23, %s1998_s26 }
  0x28   : > { %p2001_p4 = pnand %p2000_p3, %p1999_p2  ;;  %p2006_p10 = por %p2005_p8, %p2004_p5 }
  0x2a   : > { %p2002_p7 = pneg %p2001_p4 }
  0x2c   : > { %p2007_p9 = pnand %p2006_p10, %p2002_p7 }
  0x2e   : > { %2010 = shalt.err (!%p2007_p9)
}
  0x2f   : > { %s2011_s27 = scalar_lea.vmem %s2288_s29, 128  ;;  %s2122_s18 = smov [#allocation3]  }
  0x30   : > { %p2012_p0 = scmp.ne.s32.totalorder %s2288_s29, %s2011_s27  ;;  %s2016_s12 = sshll.u32 %s2122_s18, 4  ;;  %s2017_s12 = int_to_ptr.vmem [resolvable:$false] %s2016_s12 }
  0x31   : > { %s2018_s22 = scalar_lea.vmem %s2017_s12, 256  ;;  %p2019_p4 = scmp.lt.s32.totalorder %s2288_s29, %s2017_s12 }
  0x32   : > { %p2014_p1 = pnand %p2012_p0, %p2000_p3  ;;  %p2020_p12 = scmp.lt.s32.totalorder %s2018_s22, %s2011_s27 }
  0x34   : > { %p2015_p2 = pneg %p2014_p1  ;;  %p2021_p11 = por %p2020_p12, %p2019_p4 }
  0x36   : > { %p2022_p6 = pnand %p2021_p11, %p2015_p2 }
  0x38   : > { %2025 = shalt.err (!%p2022_p6)
}
  0x39   : > { %1917 = dma.hbm_to_vmem [thread:$0]  (!%p2284_p13), %s2280_s19, 128, %s2288_s29, %s419_s15  }
  0x3a   : > { %p2636_p9 = scmp.lt.s32.totalorder %s2120_s16, 3  ;;  %p2637_p7 = scmp.ge.s32.totalorder %s2120_s16, 1 }
  0x3c   : > { %p435_p0 = pnand %p2637_p7, %p2636_p9 }
  0x3d   : > { %s2315_s26 = sand.u32 (!%p435_p0), 1, %s2112_s30   ;;  %p2638_p6 = scmp.ne.s32.totalorder (!%p435_p0), %s2630_s24, 0 }
  0x3e   : > { %438 = sbr.rel (%p435_p0) target bundleno = 2460 (0x99c), region = 72  ;;  %s2619_s12 = sshll.u32 (!%p435_p0), %s2315_s26, 3 }
  0x3f   : > { %s441_s28 = scalar_lea.sflag (!%p435_p0), [#allocation4], %s2315_s26  ;;  %s444_s13 = scalar_lea.vmem (!%p435_p0), [#allocation3], %s2619_s12 }
  0x43   : > { %2095 = dma.done.wait (%p2638_p6), %s441_s28, 128  }
  0x44   : > { %2097 = vsyncadd (%p2638_p6), %s441_s28, 4294967168  ;;  %vm497_vm0 = vcmask 261120   ;;  %v2325_v0 = vld [vmem:[%s444_s13] sm:$0xff]  ;;  %v529_v7 = vld [vmem:[%s2599_s3 + $0x18] sm:$0xff]  ;;  %v2123_v8 = vmov 0.0   ;;  %vm2124_vm1 = vmmov 0  }
  0x45   : > { %v498_v1 = vsel %vm497_vm0, %v2325_v0, 0.0  ;;  %1816 = vmatprep.subr.mxu1 %v2123_v8  ;;  %v528_v9 = vld [vmem:[%s2599_s3 + $0x10] sm:$0xff]  ;;  %1824 = vmatprep.mubr.msk.f32.mxu1 %vm2124_vm1, %v2123_v8  ;;  %v527_v10 = vld [vmem:[%s2599_s3 + $0x8] sm:$0xff]  ;;  %v526_v11 = vld [vmem:[%s2599_s3] sm:$0xff]  ;;  %s2639_s1 = sld [smem:[#allocation18_spill]]  ;;  %s2125_s19 = smov 120  }
  0x46   : > { %499 = vadd.xlane.f32.xlu0 %v498_v1  ;;  %1817 = vmatpush3.msra.mxu1 %v529_v7  ;;  %s2640_s2 = sld [smem:[#allocation19_spill]]  ;;  %v1743_v21 = vld [vmem:[%s2600_s4] ss:$0 sm:$0xff]  ;;  %s2126_s24 = smov 96   ;;  %vm613_vm2 = vcmask 64512   ;;  %vm950_vm3 = vcmask 130112  }
  0x47   : > { %1837 = vmatprep.subr.mxu0 %v2123_v8  ;;  %1818 = vmatprep.subr.mxu1 %v2123_v8  ;;  %s2127_s23 = smov 88   ;;  %s2128_s20 = smov 80   ;;  %vm1124_vm4 = vcmask 195712   ;;  %vm1298_vm5 = vcmask 261312   ;;  %vm1519_vm6 = vcmask 523264  }
  0x48   : > { %1839 = vmatprep.mubr.msk.f32.mxu0 %vm2124_vm1, %v2123_v8  ;;  %1819 = vmatpush3.msra.mxu1 %v528_v9  ;;  %s2129_s21 = smov 112   ;;  %s2130_s27 = smov 72  }
  0x49   : > { %1820 = vmatprep.subr.mxu1 %v2123_v8  ;;  %s2131_s18 = smov 104   ;;  %s2132_s22 = smov 64  }
  0x4a   : > { %1821 = vmatpush3.msra.mxu1 %v527_v10  ;;  %s2133_s28 = smov 48   ;;  %s2134_s13 = smov 40  }
  0x4b   : > { %1822 = vmatprep.subr.mxu1 %v2123_v8  ;;  %v1741_v16 = vld [vmem:[%s2639_s1] ss:$0 sm:$0xff]  ;;  %s2135_s29 = smov 56   ;;  %s1740_s15 = sshll.u32 %s2315_s26, 5 }
  0x4c   : > { %1823 = vmatpush3.msra.mxu1 %v526_v11  ;;  %v1742_v18 = vld [vmem:[%s2640_s2] ss:$0 sm:$0xff]  ;;  %p2641_p12 = scmp.ne.s32.totalorder %s2631_s25, 0 }
  0x4d   : > { %1827 = vmatprep.subr.mxu1 %v2123_v8 }
  0xcf   : > { %v500_v2 = vpop.xlane.xlu0 %499 }
  0xd0   : > { %v502_v3 = vmul.f32 0.03125, %v500_v2 }
  0xd2   : > { %v503_v4 = vsub.f32 %v2325_v0, %v502_v3 }
  0xd4   : > { %v504_v5 = vmul.f32 %v503_v4, %v503_v4 }
  0xd6   : > { %v505_v6 = vsel %vm497_vm0, %v504_v5, 0.0 }
  0xd7   : > { %506 = vadd.xlane.f32.xlu0 %v505_v6 }
 0x160   : > { %v507_v12 = vpop.xlane.xlu0 %506 }
 0x161   : > { %v508_v13 = vmul.f32 0.03125, %v507_v12 }
 0x163   : > { %v509_v14 = vadd.f32 1e-06, %v508_v13 }
 0x165   : > { %1976 = vrsqrt.f32 %v509_v14 }
 0x172   : > { %v1977_v15 = vpop.eup %1976 }
 0x173   : > { %v511_v17 = vmul.f32 %v1977_v15, %v503_v4 }
 0x175   : > { %v518_v19 = vmul.f32 %v1741_v16, %v511_v17 }
 0x177   : > { %v525_v20 = vadd.f32 %v1742_v18, %v518_v19 }
 0x179   : > { %1825 = vmatmul.mubr.msk.f32.vlgmr.msra.gmra.mxu1 %vm497_vm0, %v525_v20 }
 0x17a   : > { %1829 = vmatprep.mubr.msk.f32.mxu1 %vm2124_vm1, %v2123_v8 }
 0x239   : > { %v606_v22 = vpop.f32.mrf.mxu1 }
 0x23a   : > { %v2365_v23 = vadd.f32 %v1743_v21, %v606_v22 }
 0x23b   : > { %v1826_v24 = vpop.f32.mrf.mxu1 }
 0x23c   : > { %778 = vrot.lane.b32.xlu0 %v2365_v23, %s2125_s19  ;;  %611 = vrot.lane.b32.xlu1 %v2365_v23, %s2126_s24  ;;  %s2409_s19 = scalar_lea.vmem [#allocation7], %s1740_s15  ;;  %v1304_v24 = vld [vmem:[%s2601_s5 + $0x18] sm:$0xff]  ;;  %s2138_s15 = smov 24  }
 0x240   : > { %780 = vrot.lane.b32.xlu1 %v2365_v23, %s2127_s23 }
 0x244   : > { %954 = vrot.lane.b32.xlu1 %v2365_v23, %s2128_s20  ;;  %s1775_s20 = sshll.u32 %s2238_s17, 9 }
 0x248   : > { %952 = vrot.lane.b32.xlu1 %v2365_v23, %s2129_s21  ;;  %s1627_s21 = sshll.u32 %s2409_s19, 4  ;;  %s2528_s21 = int_to_ptr.vmem [resolvable:$true] %s1627_s21 }
 0x24c   : > { %1128 = vrot.lane.b32.xlu1 %v2365_v23, %s2130_s27  ;;  %s2136_s27 = smov 8  }
 0x250   : > { %1126 = vrot.lane.b32.xlu1 %v2365_v23, %s2131_s18 }
 0x2ae   : > { %v612_v25 = vpop.permute.xlu1 %611  ;;  %v779_v27 = vpop.permute.xlu0 %778 }
 0x2af   : > { %1828 = vmatpush3.xpose.msk.msra.mxu1 %vm613_vm2, %v612_v25  ;;  %v1303_v25 = vld [vmem:[%s2601_s5 + $0x10] sm:$0xff] }
 0x2b0   : > { %1832 = vmatprep.subr.mxu1 %v2123_v8 }
 0x2b2   : > { %1830 = vmatmul.mubr.msk.f32.vlgmr.msra.gmra.mxu1 %vm613_vm2, %v2365_v23  ;;  %v781_v26 = vpop.permute.xlu1 %780 }
 0x2b3   : > { %1838 = vmatpush3.xpose.msk.msra.mxu0 %vm613_vm2, %v781_v26  ;;  %1834 = vmatprep.mubr.msk.f32.mxu1 %vm2124_vm1, %v2123_v8 }
 0x2b4   : > { %1847 = vmatprep.subr.mxu0 %v2123_v8 }
 0x2b6   : > { %1840 = vmatmul.mubr.msk.f32.vlgmr.msra.gmra.mxu0 %vm613_vm2, %v779_v27  ;;  %v955_v28 = vpop.permute.xlu1 %954  ;;  %v1302_v27 = vld [vmem:[%s2601_s5 + $0x8] sm:$0xff] }
 0x2b7   : > { %1848 = vmatpush3.xpose.msk.msra.mxu0 %vm613_vm2, %v955_v28  ;;  %1849 = vmatprep.mubr.msk.f32.mxu0 %vm2124_vm1, %v2123_v8 }
 0x2b8   : > { %1857 = vmatprep.subr.mxu0 %v2123_v8 }
 0x2ba   : > { %v953_v29 = vpop.permute.xlu1 %952 }
 0x2bb   : > { %1850 = vmatmul.mubr.msk.f32.vlgmr.msra.gmra.mxu0 %vm613_vm2, %v953_v29  ;;  %v1301_v29 = vld [vmem:[%s2601_s5] sm:$0xff] }
 0x2bc   : > { %1859 = vmatprep.mubr.msk.f32.mxu0 %vm2124_vm1, %v2123_v8 }
 0x2be   : > { %v1129_v30 = vpop.permute.xlu1 %1128 }
 0x2bf   : > { %1858 = vmatpush3.xpose.msk.msra.mxu0 %vm613_vm2, %v1129_v30 }
 0x2c0   : > { %1867 = vmatprep.subr.mxu0 %v2123_v8 }
 0x2c2   : > { %v1127_v31 = vpop.permute.xlu1 %1126 }
 0x2c3   : > { %1860 = vmatmul.mubr.msk.f32.vlgmr.msra.gmra.mxu0 %vm613_vm2, %v1127_v31 }
 0x2c4   : > { %1875 = vmatprep.mubr.msk.f32.mxu0 %vm2124_vm1, %v2123_v8  ;;  %1868 = vmatpush3.msra.mxu0 %v1304_v24 }
 0x2c5   : > { %1869 = vmatprep.subr.mxu0 %v2123_v8 }
 0x2c6   : > { %1870 = vmatpush3.msra.mxu0 %v1303_v25 }
 0x2c7   : > { %1871 = vmatprep.subr.mxu0 %v2123_v8 }
 0x2c8   : > { %1872 = vmatpush3.msra.mxu0 %v1302_v27 }
 0x2c9   : > { %1873 = vmatprep.subr.mxu0 %v2123_v8 }
 0x2ca   : > { %1874 = vmatpush3.msra.mxu0 %v1301_v29 }
 0x2cb   : > { %1889 = vmatprep.subr.mxu0 %v2123_v8 }
 0x372   : > { %v684_v32 = vpop.f32.mrf.mxu1 }
 0x373   : > { %v688_v33 = vmul.f32 0.35355338, %v684_v32 }
 0x374   : > { %v1831_v34 = vpop.f32.mrf.mxu1 }
 0x375   : > { %v689_v35 = vsel %vm613_vm2, %v688_v33, -inf }
 0x376   : > { %v852_v36 = vpop.f32.mrf.mxu0  ;;  %690 = vmax.xlane.f32.xlu1 %v689_v35 }
 0x377   : > { %v856_v37 = vmul.f32 0.35355338, %v852_v36 }
 0x378   : > { %v1841_v38 = vpop.f32.mrf.mxu0 }
 0x379   : > { %v857_v39 = vsel %vm613_vm2, %v856_v37, -inf  ;;  %v1760_v38 = vld [vmem:[%s2602_s6] ss:$0 sm:$0xff] }
 0x37a   : > { %858 = vmax.xlane.f32.xlu0 %v857_v39 }
 0x37b   : > { %v1026_v40 = vpop.f32.mrf.mxu0 }
 0x37c   : > { %v1030_v41 = vmul.f32 0.35355338, %v1026_v40 }
 0x37d   : > { %v1851_v42 = vpop.f32.mrf.mxu0 }
 0x37e   : > { %v1031_v43 = vsel %vm613_vm2, %v1030_v41, -inf }
 0x37f   : > { %1032 = vmax.xlane.f32.xlu1 %v1031_v43 }
 0x383   : > { %v1200_v44 = vpop.f32.mrf.mxu0 }
 0x384   : > { %v1204_v45 = vmul.f32 0.35355338, %v1200_v44 }
 0x385   : > { %v1861_v46 = vpop.f32.mrf.mxu0 }
 0x386   : > { %v1205_v47 = vsel %vm613_vm2, %v1204_v45, -inf }
 0x387   : > { %1206 = vmax.xlane.f32.xlu0 %v1205_v47 }
 0x390   : > { %701 = vrot.lane.b32.xlu1 %v2365_v23, %s2132_s22 }
 0x3ff   : > { %v691_v48 = vpop.xlane.xlu1 %690 }
 0x400   : > { %v692_v49 = vsub.f32 %v688_v33, %v691_v48 }
 0x402   : > { %v693_v50 = vmul.f32 1.442695, %v692_v49  ;;  %v1418_v49 = vld [vmem:[%s2605_s9 + $0x18] sm:$0xff] }
 0x403   : > { %v859_v51 = vpop.xlane.xlu0 %858 }
 0x404   : > { %1978 = vpow2.f32 %v693_v50  ;;  %v860_v52 = vsub.f32 %v856_v37, %v859_v51  ;;  %v1416_v50 = vld [vmem:[%s2605_s9 + $0x8] sm:$0xff]  ;;  %v1415_v51 = vld [vmem:[%s2605_s9] sm:$0xff] }
 0x406   : > { %v861_v53 = vmul.f32 1.442695, %v860_v52 }
 0x408   : > { %1980 = vpow2.f32 %v861_v53  ;;  %v1033_v54 = vpop.xlane.xlu1 %1032 }
 0x409   : > { %v1034_v55 = vsub.f32 %v1030_v41, %v1033_v54 }
 0x40b   : > { %v1035_v56 = vmul.f32 1.442695, %v1034_v55 }
 0x40c   : > { %v702_v57 = vpop.permute.xlu1 %701 }
 0x40d   : > { %1982 = vpow2.f32 %v1035_v56  ;;  %1833 = vmatpush3.msra.mxu1 %v702_v57  ;;  %v1762_v56 = vld [vmem:[%s2603_s7] ss:$0 sm:$0xff] }
 0x40e   : > { %1842 = vmatprep.subr.mxu1 %v2123_v8 }
 0x410   : > { %v1207_v58 = vpop.xlane.xlu0 %1206 }
 0x411   : > { %v1979_v59 = vpop.eup %1978  ;;  %v1208_v60 = vsub.f32 %v1204_v45, %v1207_v58  ;;  %v1763_v58 = vld [vmem:[%s2604_s8] ss:$0 sm:$0xff] }
 0x412   : > { %v695_v61 = vsel %vm613_vm2, %v1979_v59, 0.0 }
 0x413   : > { %v1209_v62 = vmul.f32 1.442695, %v1208_v60  ;;  %696 = vadd.xlane.f32.xlu1 %v695_v61  ;;  %v1511_v61 = vld [vmem:[%s2607_s11 + $0x38] sm:$0xff] }
 0x415   : > { %v1981_v63 = vpop.eup %1980  ;;  %1984 = vpow2.f32 %v1209_v62  ;;  %v1510_v62 = vld [vmem:[%s2607_s11 + $0x30] sm:$0xff] }
 0x416   : > { %v863_v1 = vsel %vm613_vm2, %v1981_v63, 0.0 }
 0x417   : > { %864 = vadd.xlane.f32.xlu0 %v863_v1  ;;  %v1508_v1 = vld [vmem:[%s2607_s11 + $0x20] sm:$0xff] }
 0x41a   : > { %v1983_v2 = vpop.eup %1982 }
 0x41b   : > { %v1037_v3 = vsel %vm613_vm2, %v1983_v2, 0.0 }
 0x41c   : > { %1038 = vadd.xlane.f32.xlu1 %v1037_v3  ;;  %v1506_v3 = vld [vmem:[%s2607_s11 + $0x10] sm:$0xff] }
 0x422   : > { %v1985_v4 = vpop.eup %1984 }
 0x423   : > { %v1211_v5 = vsel %vm613_vm2, %v1985_v4, 0.0 }
 0x424   : > { %1212 = vadd.xlane.f32.xlu0 %v1211_v5  ;;  %v1504_v5 = vld [vmem:[%s2607_s11] sm:$0xff] }
 0x42d   : > { %1044 = vrot.lane.b32.xlu1 %v2365_v23, %s2133_s28  ;;  %s2526_s28 = scalar_lea.hbm %s2610_s14, %s1775_s20 }
 0x431   : > { %1218 = vrot.lane.b32.xlu1 %v2365_v23, %s2134_s13  ;;  %s1601_s13 = scalar_lea.sflag [#allocation8], %s2315_s26 }
 0x43a   : > { %870 = vrot.lane.b32.xlu0 %v2365_v23, %s2135_s29  ;;  %s2137_s29 = smov 16  }
 0x49c   : > { %v697_v6 = vpop.xlane.xlu1 %696 }
 0x49d   : > { %1986 = vrcp.f32 %v697_v6  ;;  %v1764_v6 = vld [vmem:[%s2606_s10] ss:$0 sm:$0xff] }
 0x4a0   : > { %v865_v7 = vpop.xlane.xlu0 %864 }
 0x4a1   : > { %1988 = vrcp.f32 %v865_v7 }
 0x4a5   : > { %v1039_v9 = vpop.xlane.xlu1 %1038 }
 0x4a6   : > { %1990 = vrcp.f32 %v1039_v9 }
 0x4a9   : > { %v1045_v15 = vpop.permute.xlu1 %1044 }
 0x4aa   : > { %v1987_v10 = vpop.eup %1986 }
 0x4ab   : > { %v699_v11 = vmul.f32 %v1987_v10, %v1979_v59 }
 0x4ad   : > { %v1213_v12 = vpop.xlane.xlu0 %1212  ;;  %700 = vst.msk [vmem:[%s2409_s19] sm:$0xff] %vm613_vm2, %v699_v11  ;;  %1835 = vmatmul.mubr.msk.f32.vlgmr.msra.gmra.mxu1 %vm613_vm2, %v699_v11  ;;  %v1219_v19 = vpop.permute.xlu1 %1218 }
 0x4ae   : > { %v1989_v13 = vpop.eup %1988  ;;  %1992 = vrcp.f32 %v1213_v12  ;;  %1844 = vmatprep.mubr.msk.f32.mxu1 %vm2124_vm1, %v2123_v8 }
 0x4af   : > { %v867_v14 = vmul.f32 %v1989_v13, %v1981_v63  ;;  %v1509_v63 = vld [vmem:[%s2607_s11 + $0x28] sm:$0xff] }
 0x4b1   : > { %v871_v16 = vpop.permute.xlu0 %870  ;;  %1750 = vst.msk [vmem:[%s2409_s19 + $0x8] sm:$0xff] %vm613_vm2, %v867_v14 }
 0x4b2   : > { %1843 = vmatpush3.msra.mxu1 %v871_v16 }
 0x4b3   : > { %v1991_v17 = vpop.eup %1990  ;;  %1845 = vmatmul.mubr.msk.f32.vlgmr.msra.gmra.mxu1 %vm613_vm2, %v867_v14  ;;  %1852 = vmatprep.subr.mxu1 %v2123_v8 }
 0x4b4   : > { %1853 = vmatpush3.msra.mxu1 %v1045_v15  ;;  %1854 = vmatprep.mubr.msk.f32.mxu1 %vm2124_vm1, %v2123_v8  ;;  %v1041_v18 = vmul.f32 %v1991_v17, %v1983_v2  ;;  %v1507_v2 = vld [vmem:[%s2607_s11 + $0x18] sm:$0xff] }
 0x4b5   : > { %1862 = vmatprep.subr.mxu1 %v2123_v8 }
 0x4b6   : > { %1754 = vst.msk [vmem:[%s2409_s19 + $0x10] sm:$0xff] %vm613_vm2, %v1041_v18 }
 0x4b7   : > { %1855 = vmatmul.mubr.msk.f32.vlgmr.msra.gmra.mxu1 %vm613_vm2, %v1041_v18 }
 0x4b8   : > { %1863 = vmatpush3.msra.mxu1 %v1219_v19  ;;  %1864 = vmatprep.mubr.msk.f32.mxu1 %vm2124_vm1, %v2123_v8 }
 0x4b9   : > { %1878 = vmatprep.subr.mxu1 %v2123_v8 }
 0x4bb   : > { %v1993_v20 = vpop.eup %1992 }
 0x4bc   : > { %v1215_v21 = vmul.f32 %v1993_v20, %v1985_v4  ;;  %v1505_v4 = vld [vmem:[%s2607_s11 + $0x8] sm:$0xff] }
 0x4be   : > { %1758 = vst.msk [vmem:[%s2409_s19 + $0x18] sm:$0xff] %vm613_vm2, %v1215_v21  ;;  %1865 = vmatmul.mubr.msk.f32.vlgmr.msra.gmra.mxu1 %vm613_vm2, %v1215_v21 }
 0x4bf   : > { %1886 = vmatprep.mubr.msk.f32.mxu1 %vm2124_vm1, %v2123_v8  ;;  %1879 = vmatpush3.msra.mxu1 %v1418_v49 }
 0x4c0   : > { %1880 = vmatprep.subr.mxu1 %v2123_v8 }
 0x56d   : > { %v773_v22 = vpop.f32.mrf.mxu1 }
 0x56e   : > { %777 = vst.msk [vmem:[#allocation2] sm:$0xff] %vm613_vm2, %v773_v22 }
 0x56f   : > { %v1836_v23 = vpop.f32.mrf.mxu1 }
 0x573   : > { %v942_v26 = vpop.f32.mrf.mxu1 }
 0x574   : > { %947 = vrot.lane.b32.xlu0 %v942_v26, %s2136_s27 }
 0x575   : > { %v1846_v28 = vpop.f32.mrf.mxu1 }
 0x577   : > { %v1116_v30 = vpop.f32.mrf.mxu1 }
 0x578   : > { %1121 = vrot.lane.b32.xlu1 %v1116_v30, %s2137_s29  ;;  %s2026_s29 = scalar_lea.vmem %s2528_s21, 512 }
 0x579   : > { %v1856_v31 = vpop.f32.mrf.mxu1  ;;  %p2027_p11 = scmp.ne.s32.totalorder %s2528_s21, %s2026_s29 }
 0x57b   : > { %p2028_p13 = pnand %p2027_p11, %p2641_p12 }
 0x57d   : > { %p2029_p1 = pneg %p2028_p13 }
 0x57e   : > { %v1290_v32 = vpop.f32.mrf.mxu1 }
 0x57f   : > { %1295 = vrot.lane.b32.xlu0 %v1290_v32, %s2138_s15  ;;  %s2139_s15 = smov [#allocation7]  }
 0x580   : > { %v1866_v33 = vpop.f32.mrf.mxu1  ;;  %s2030_s24 = sshll.u32 %s2139_s15, 4  ;;  %s2031_s24 = int_to_ptr.vmem [resolvable:$false] %s2030_s24 }
 0x581   : > { %s2032_s19 = scalar_lea.vmem %s2031_s24, 1024  ;;  %p2033_p3 = scmp.lt.s32.totalorder %s2528_s21, %s2031_s24 }
 0x582   : > { %p2034_p5 = scmp.lt.s32.totalorder %s2032_s19, %s2026_s29 }
 0x584   : > { %p2035_p8 = por %p2034_p5, %p2033_p3 }
 0x586   : > { %p2036_p10 = pnand %p2035_p8, %p2029_p1 }
 0x5e6   : > { %v948_v34 = vpop.permute.xlu0 %947 }
 0x5e7   : > { %951 = vst.msk [vmem:[#allocation2] sm:$0xff] %vm950_vm3, %v948_v34 }
 0x5ea   : > { %v1122_v35 = vpop.permute.xlu1 %1121 }
 0x5eb   : > { %1125 = vst.msk [vmem:[#allocation2] sm:$0xff] %vm1124_vm4, %v1122_v35 }
 0x5f1   : > { %v1296_v36 = vpop.permute.xlu0 %1295 }
 0x5f2   : > { %1299 = vst.msk [vmem:[#allocation2] sm:$0xff] %vm1298_vm5, %v1296_v36 }
 0x5f9   : > { %v1300_v37 = vld [vmem:[#allocation2] sm:$0xff] }
 0x5fa   : > { %1876 = vmatmul.mubr.msk.f32.vlgmr.msra.gmra.mxu0 %vm497_vm0, %v1300_v37 }
 0x5fb   : > { %1905 = vmatprep.mubr.msk.f32.mxu0 %vm2124_vm1, %v2123_v8  ;;  %1890 = vmatpush3.msra.mxu0 %v1511_v61 }
 0x5fc   : > { %1891 = vmatprep.subr.mxu0 %v2123_v8 }
 0x5fd   : > { %1892 = vmatpush3.msra.mxu0 %v1510_v62 }
 0x5fe   : > { %1893 = vmatprep.subr.mxu0 %v2123_v8 }
 0x5ff   : > { %1894 = vmatpush3.msra.mxu0 %v1509_v63 }
 0x600   : > { %1895 = vmatprep.subr.mxu0 %v2123_v8 }
 0x601   : > { %1896 = vmatpush3.msra.mxu0 %v1508_v1 }
 0x602   : > { %1897 = vmatprep.subr.mxu0 %v2123_v8 }
 0x603   : > { %1898 = vmatpush3.msra.mxu0 %v1507_v2 }
 0x604   : > { %1899 = vmatprep.subr.mxu0 %v2123_v8 }
 0x605   : > { %1900 = vmatpush3.msra.mxu0 %v1506_v3 }
 0x606   : > { %1901 = vmatprep.subr.mxu0 %v2123_v8 }
 0x607   : > { %1902 = vmatpush3.msra.mxu0 %v1505_v4 }
 0x608   : > { %1903 = vmatprep.subr.mxu0 %v2123_v8 }
 0x609   : > { %1904 = vmatpush3.msra.mxu0 %v1504_v5 }
 0x6ba   : > { %v1381_v39 = vpop.f32.mrf.mxu0 }
 0x6bb   : > { %v1382_v40 = vadd.f32 %v1760_v38, %v1381_v39 }
 0x6bc   : > { %v1877_v41 = vpop.f32.mrf.mxu0 }
 0x6bd   : > { %v2459_v42 = vadd.f32 %v1382_v40, %v2325_v0  ;;  %v1417_v0 = vld [vmem:[%s2605_s9 + $0x10] sm:$0xff] }
 0x6be   : > { %1881 = vmatpush3.msra.mxu1 %v1417_v0 }
 0x6bf   : > { %v1388_v43 = vsel %vm497_vm0, %v2459_v42, 0.0  ;;  %1882 = vmatprep.subr.mxu1 %v2123_v8 }
 0x6c0   : > { %1389 = vadd.xlane.f32.xlu1 %v1388_v43  ;;  %1883 = vmatpush3.msra.mxu1 %v1416_v50 }
 0x6c1   : > { %1884 = vmatprep.subr.mxu1 %v2123_v8 }
 0x6c2   : > { %1885 = vmatpush3.msra.mxu1 %v1415_v51 }
 0x749   : > { %v1390_v44 = vpop.xlane.xlu1 %1389 }
 0x74a   : > { %v1391_v45 = vmul.f32 0.03125, %v1390_v44 }
 0x74c   : > { %v1392_v46 = vsub.f32 %v2459_v42, %v1391_v45 }
 0x74e   : > { %v1393_v47 = vmul.f32 %v1392_v46, %v1392_v46 }
 0x750   : > { %v1394_v48 = vsel %vm497_vm0, %v1393_v47, 0.0 }
 0x751   : > { %1395 = vadd.xlane.f32.xlu0 %v1394_v48 }
 0x7da   : > { %v1396_v52 = vpop.xlane.xlu0 %1395 }
 0x7db   : > { %v1397_v53 = vmul.f32 0.03125, %v1396_v52 }
 0x7dd   : > { %v1398_v54 = vadd.f32 1e-06, %v1397_v53 }
 0x7df   : > { %1994 = vrsqrt.f32 %v1398_v54 }
 0x7ec   : > { %v1995_v55 = vpop.eup %1994 }
 0x7ed   : > { %v1400_v57 = vmul.f32 %v1995_v55, %v1392_v46 }
 0x7ef   : > { %v1407_v59 = vmul.f32 %v1762_v56, %v1400_v57 }
 0x7f1   : > { %v1414_v60 = vadd.f32 %v1763_v58, %v1407_v59 }
 0x7f3   : > { %1887 = vmatmul.mubr.msk.f32.vlgmr.msra.gmra.mxu1 %vm497_vm0, %v1414_v60 }
 0x8b3   : > { %v1495_v7 = vpop.f32.mrf.mxu1 }
 0x8b4   : > { %v1496_v9 = vadd.f32 %v1764_v6, %v1495_v7 }
 0x8b5   : > { %v1888_v10 = vpop.f32.mrf.mxu1 }
 0x8b6   : > { %v1500_v11 = vmul.f32 0.70710677, %v1496_v9  ;;  %v1499_v13 = vmul.f32 0.5, %v1496_v9 }
 0x8b8   : > { %1996 = verf.f32 %v1500_v11 }
 0x8c5   : > { %v1997_v12 = vpop.eup %1996 }
 0x8c6   : > { %v1502_v14 = vadd.f32 1.0, %v1997_v12 }
 0x8c8   : > { %v1503_v15 = vmul.f32 %v1502_v14, %v1499_v13 }
 0x8ca   : > { %1906 = vmatmul.mubr.msk.f32.vlgmr.msra.gmra.mxu0 %vm1519_vm6, %v1503_v15 }
 0x8cb   : > { %2039 = shalt.err (!%p2036_p10)
}
 0x8cc   : > { %s2040_s23 = scalar_lea.hbm %s2526_s28, 512  ;;  %s2044_s22 = scalar_lea.hbm %s2610_s14, 1024 }
 0x8cd   : > { %p2041_p2 = scmp.ne.s32.totalorder %s2526_s28, %s2040_s23  ;;  %p2045_p7 = scmp.lt.s32.totalorder %s2526_s28, %s2610_s14 }
 0x8ce   : > { %p2046_p0 = scmp.lt.s32.totalorder %s2044_s22, %s2040_s23 }
 0x8cf   : > { %p2042_p4 = pnand %p2041_p2, %p2641_p12 }
 0x8d0   : > { %p2047_p6 = por %p2046_p0, %p2045_p7 }
 0x8d1   : > { %p2043_p9 = pneg %p2042_p4 }
 0x8d3   : > { %p2048_p11 = pnand %p2047_p6, %p2043_p9 }
 0x8d5   : > { %2051 = shalt.err (!%p2048_p11)
}
 0x8d6   : > { %s2140_s29 = smov 128   ;;  %s2642_s19 = sld [smem:[#allocation20_spill]] }
 0x8d7   : > { %1911 = dma.vmem_to_hbm [thread:$0]  (%p2641_p12), %s2528_s21, 512, %s2526_s28, %s1601_s13, %s2140_s29, %s2140_s29, %s2136_s27  }
 0x8d8   : > { %s1770_s23 = sshll.u32 %s2238_s17, 7  ;;  %s2643_s20 = sshll.u32 %s2315_s26, 3 }
 0x8d9   : > { %s486_s18 = scalar_lea.vmem [#allocation6], %s2643_s20  ;;  %s2644_s1 = sld [smem:[#allocation21_spill]] }
 0x8da   : > { %s1614_s22 = sshll.u32 %s486_s18, 4  ;;  %s1596_s27 = scalar_lea.sflag [#allocation5], %s2315_s26  ;;  %s1615_s22 = int_to_ptr.vmem [resolvable:$true] %s1614_s22 }
 0x8db   : > { %s2052_s21 = scalar_lea.vmem %s1615_s22, 128  ;;  %s2141_s17 = smov [#allocation6]  }
 0x8dc   : > { %v1766_v8 = vld [vmem:[%s2642_s19] ss:$0 sm:$0xff]  ;;  %p2053_p13 = scmp.ne.s32.totalorder %s1615_s22, %s2052_s21  ;;  %s2056_s28 = sshll.u32 %s2141_s17, 4  ;;  %s2057_s28 = int_to_ptr.vmem [resolvable:$false] %s2056_s28 }
 0x8dd   : > { %s2058_s13 = scalar_lea.vmem %s2057_s28, 256  ;;  %p2059_p5 = scmp.lt.s32.totalorder %s1615_s22, %s2057_s28 }
 0x8de   : > { %p2054_p1 = pnand %p2053_p13, %p2641_p12  ;;  %p2060_p8 = scmp.lt.s32.totalorder %s2058_s13, %s2052_s21 }
 0x8df   : > { %s1612_s2 = scalar_lea.hbm %s2644_s1, %s1770_s23 }
 0x8e0   : > { %p2055_p3 = pneg %p2054_p1  ;;  %p2061_p10 = por %p2060_p8, %p2059_p5 }
 0x8e2   : > { %p2062_p2 = pnand %p2061_p10, %p2055_p3 }
 0x98a   : > { %v1589_v16 = vpop.f32.mrf.mxu0 }
 0x98b   : > { %v1590_v17 = vadd.f32 %v1766_v8, %v1589_v16 }
 0x98c   : > { %v1907_v18 = vpop.f32.mrf.mxu0 }
 0x98d   : > { %v1593_v19 = vadd.f32 %v1590_v17, %v2459_v42 }
 0x98f   : > { %1594 = vst.msk [vmem:[%s486_s18] sm:$0xff] %vm497_vm0, %v1593_v19 }
 0x990   : > { %2065 = shalt.err (!%p2062_p2)
}
 0x991   : > { %s2066_s0 = scalar_lea.hbm %s1612_s2, 128  ;;  %s2070_s24 = scalar_lea.hbm %s2644_s1, 256 }
 0x992   : > { %p2067_p4 = scmp.ne.s32.totalorder %s1612_s2, %s2066_s0  ;;  %p2071_p0 = scmp.lt.s32.totalorder %s1612_s2, %s2644_s1 }
 0x993   : > { %p2072_p6 = scmp.lt.s32.totalorder %s2070_s24, %s2066_s0 }
 0x994   : > { %p2068_p9 = pnand %p2067_p4, %p2641_p12 }
 0x995   : > { %p2073_p11 = por %p2072_p6, %p2071_p0 }
 0x996   : > { %p2069_p7 = pneg %p2068_p9 }
 0x998   : > { %p2074_p13 = pnand %p2073_p11, %p2069_p7 }
 0x99a   : > { %2077 = shalt.err (!%p2074_p13)
}
 0x99b   : > { %1910 = dma.vmem_to_hbm [thread:$0]  (%p2641_p12), %s1615_s22, 128, %s1612_s2, %s1596_s27  }
 0x99c PF: > { %s2645_s23 = sld [smem:[#allocation12_spill]]  ;;  %p2648_p3 = scmp.ge.s32.totalorder %s2120_s16, 2 }
 0x99d   : > { %s2646_s20 = sld [smem:[#allocation16_spill]] }
 0x9a2   : > { %s1642_s18 = sand.u32 1, %s2645_s23  }
 0x9a3   : > { %p2647_p1 = scmp.ne.s32.totalorder %s2646_s20, 0  ;;  %s1643_s15 = scalar_lea.sflag [#allocation5], %s1642_s18 }
 0x9a5   : > { %p1919_p5 = pnand %p2648_p3, %p2647_p1 }
 0x9a7   : > { %p1920_p8 = pneg %p1919_p5 }
 0x9a9   : > { %2099 = dma.done.wait (%p1920_p8), %s1643_s15, 128  }
 0x9aa   : > { %2101 = vsyncadd (%p1920_p8), %s1643_s15, 4294967168  ;;  %s1652_s21 = scalar_lea.sflag [#allocation8], %s1642_s18 }
 0x9ab   : > { %2103 = dma.done.wait (%p1920_p8), %s1652_s21, 512  }
 0x9ac   : > { %2105 = vsyncadd (%p1920_p8), %s1652_s21, 4294966784  ;;  %s2649_s16 = sld [smem:[#allocation14_spill]]  ;;  %s2652_s29 = smov %s2112_s30 }
 0x9ad   : > { %s2650_s17 = sld [smem:[#allocation13_spill]] }
 0x9ae   : > { %s2651_s15 = sld [smem:[#allocation15_spill]] }
 0x9b2   : > { %p31_p12 = scmp.ge.s32.totalorder %s2649_s16, 4  }
 0x9b3   : > { %s2653_s30 = smov %s2650_s17 }
 0x9b4   :  { %33 = sbr.rel (!%p31_p12) target bundleno = 13 (0xd), region = 137 }
 0x9b9   :  { %1657 = vsyncpa [#allocation4], 1 }
 0x9ba   :  { %1659 = vsyncpa [#allocation4 + $0x1], 1 }
 0x9bb   :  { %1660 = vsyncpa [#allocation5], 1 }
 0x9bc   :  { %1662 = vsyncpa [#allocation5 + $0x1], 1 }
 0x9bd   :  { %1663 = vsyncpa [#allocation8], 1 }
 0x9be   :  { %1665 = vsyncpa [#allocation8 + $0x1], 1 }

// kernel: tpu_custom_call.1
= control target key start
LH: loop header
LB: loop body
LE: loop exit
PB: predicated region body
PF: predicated region fallthrough
CT: control target
= control target key end

     0   :  { %s2596_s0 = inlined_call_operand.hbm [shape: f32[2,8,32], index: 0, kind: input, shape index: {}]   ;;  %s2597_s1 = inlined_call_operand.vmem [shape: f32[1,32], index: 1, kind: input, shape index: {}]   ;;  %s2598_s2 = inlined_call_operand.vmem [shape: f32[1,32], index: 2, kind: input, shape index: {}]   ;;  %s2599_s3 = inlined_call_operand.vmem [shape: f32[32,96], index: 3, kind: input, shape index: {}]   ;;  %s2600_s4 = inlined_call_operand.vmem [shape: f32[1,96], index: 4, kind: input, shape index: {}]   ;;  %s2601_s5 = inlined_call_operand.vmem [shape: f32[32,32], index: 5, kind: input, shape index: {}]   ;;  %s2602_s6 = inlined_call_operand.vmem [shape: f32[1,32], index: 6, kind: input, shape index: {}]   ;;  %s2603_s7 = inlined_call_operand.vmem [shape: f32[1,32], index: 7, kind: input, shape index: {}]   ;;  %s2604_s8 = inlined_call_operand.vmem [shape: f32[1,32], index: 8, kind: input, shape index: {}]   ;;  %s2605_s9 = inlined_call_operand.vmem [shape: f32[32,64], index: 9, kind: input, shape index: {}]   ;;  %s2606_s10 = inlined_call_operand.vmem [shape: f32[1,64], index: 10, kind: input, shape index: {}]   ;;  %s2607_s11 = inlined_call_operand.vmem [shape: f32[64,32], index: 11, kind: input, shape index: {}]   ;;  %s2608_s12 = inlined_call_operand.vmem [shape: f32[1,32], index: 12, kind: input, shape index: {}]   ;;  %s2609_s13 = inlined_call_operand.hbm [shape: f32[2,8,32], index: 13, kind: output, shape index: {0}]   ;;  %s2610_s14 = inlined_call_operand.hbm [shape: f32[2,4,8,8], index: 14, kind: output, shape index: {1}]  }
   0x1   :  { %2620 = sst [smem:[#allocation17_spill]] %s2596_s0 }
   0x2   :  { %2621 = sst [smem:[#allocation18_spill]] %s2597_s1 }
   0x3   :  { %2622 = sst [smem:[#allocation19_spill]] %s2598_s2 }
   0x4   :  { %2623 = sst [smem:[#allocation20_spill]] %s2608_s12 }
   0x5   :  { %2624 = sst [smem:[#allocation21_spill]] %s2609_s13 }
   0x6   :  { %20 = vsyncpa [#allocation4], 0 }
   0x7   :  { %22 = vsyncpa [#allocation4 + $0x1], 0 }
   0x8   :  { %23 = vsyncpa [#allocation5], 0 }
   0x9   :  { %25 = vsyncpa [#allocation5 + $0x1], 0 }
   0xa   :  { %26 = vsyncpa [#allocation8], 0 }
   0xb   :  { %28 = vsyncpa [#allocation8 + $0x1], 0  ;;  %s2217_s29 = smov 0   ;;  %s2219_s30 = smov 0  }
   0xc   :  { %s2221_s15 = smov 0   ;;  %s2223_s16 = smov 0  }
   0xd LB: > { %2625 = sst [smem:[#allocation12_spill]] %s2108_s29  ;;  %s2238_s17 = sadd.s32 4294967295, %s2120_s16   ;;  %s2120_s16 = sphi %s2223_s16, %s2649_s16   ;;  %s2116_s15 = sphi %s2221_s15, %s2651_s15   ;;  %s2112_s30 = sphi %s2219_s30, %s2653_s30   ;;  %s2108_s29 = sphi %s2217_s29, %s2652_s29  }
   0xe   : > { %2626 = sst [smem:[#allocation13_spill]] %s2116_s15  ;;  %s1732_s18 = sadd.s32 4294967294, %s2120_s16  }
   0xf   : > { %s2242_s19 = sadd.s32 1, %s2120_s16   ;;  %s41_s20 = sadd.s32 1, %s2116_s15 }
  0x10   : > { %2627 = sst [smem:[#allocation14_spill]] %s2242_s19  ;;  %s38_s21 = ssub.s32 %s2120_s16, %s2242_s19 }
  0x11   : > { %p48_p0 = scmp.ne.s32.totalorder %s2116_s15, %s2112_s30  ;;  %p39_p1 = scmp.eq.s32.totalorder %s38_s21, 0 }
  0x12   : > { %p49_p2 = scmp.eq.s32.totalorder %s2120_s16, 0  ;;  %p54_p3 = scmp.ne.s32.totalorder %s2112_s30, %s2108_s29 }
  0x13   : > { %p55_p4 = scmp.eq.s32.totalorder %s2238_s17, 0  ;;  %p330_p7 = scmp.eq.s32.totalorder %s2238_s17, 1 }
  0x14   : > { %s2254_s22 = scalar_select %p39_p1, %s2116_s15, %s41_s20  }
  0x15   : > { %p2256_p5 = por %p49_p2, %p48_p0  ;;  %p2260_p6 = por %p55_p4, %p54_p3 }
  0x16   : > { %2628 = sst [smem:[#allocation15_spill]] %s2254_s22  ;;  %p336_p8 = scmp.eq.s32.totalorder %s1732_s18, 1 }
  0x17   : > { %s2630_s24 = scalar_select %p2260_p6, 1, 0 }
  0x18   : > { %p1925_p10 = scmp.lt.s32.totalorder %s2120_s16, 2  ;;  %p2267_p11 = por %p330_p7, %p48_p0 }
  0x19   : > { %p2271_p12 = por %p336_p8, %p54_p3  ;;  %s418_s27 = sand.u32 1, %s2116_s15  }
  0x1a   : > { %s2631_s25 = scalar_select %p2267_p11, 1, 0 }
  0x1b   : > { %s2632_s26 = scalar_select %p2271_p12, 1, 0 }
  0x1c   : > { %s1736_s28 = sshll.u32 %s2120_s16, 7  ;;  %s1735_s20 = sshll.u32 %s418_s27, 3 }
  0x1d   : > { %2633 = sst [smem:[#allocation16_spill]] %s2632_s26  ;;  %s422_s18 = scalar_lea.vmem [#allocation3], %s1735_s20 }
  0x1e   : > { %s2634_s0 = sld [smem:[#allocation17_spill]]  ;;  %s429_s29 = sshll.u32 %s422_s18, 4  ;;  %s2288_s29 = int_to_ptr.vmem [resolvable:$true] %s429_s29 }
  0x1f   : > { %p2284_p13 = pnand %p1925_p10, %p2256_p5  ;;  %s419_s15 = scalar_lea.sflag [#allocation4], %s418_s27 }
  0x21   : > { %p2000_p3 = pneg %p2284_p13 }
  0x24   : > { %s2280_s19 = scalar_lea.hbm %s2634_s0, %s1736_s28  ;;  %s2003_s23 = scalar_lea.hbm %s2634_s0, 256 }
  0x25   : > { %s1998_s26 = scalar_lea.hbm %s2280_s19, 128  ;;  %p2004_p5 = scmp.lt.s32.totalorder %s2280_s19, %s2634_s0 }
  0x26   : > { %p1999_p2 = scmp.ne.s32.totalorder %s2280_s19, %s1998_s26  ;;  %p2005_p8 = scmp.lt.s32.totalorder %s2003_s23, %s1998_s26 }
  0x28   : > { %p2001_p4 = pnand %p2000_p3, %p1999_p2  ;;  %p2006_p10 = por %p2005_p8, %p2004_p5 }
  0x2a   : > { %p2002_p7 = pneg %p2001_p4 }
  0x2c   : > { %p2007_p9 = pnand %p2006_p10, %p2002_p7 }
  0x2e   : > { %2010 = shalt.err (!%p2007_p9)
}
  0x2f   : > { %s2011_s27 = scalar_lea.vmem %s2288_s29, 128  ;;  %s2122_s18 = smov [#allocation3]  }
  0x30   : > { %p2012_p0 = scmp.ne.s32.totalorder %s2288_s29, %s2011_s27  ;;  %s2016_s12 = sshll.u32 %s2122_s18, 4  ;;  %s2017_s12 = int_to_ptr.vmem [resolvable:$false] %s2016_s12 }
  0x31   : > { %s2018_s22 = scalar_lea.vmem %s2017_s12, 256  ;;  %p2019_p4 = scmp.lt.s32.totalorder %s2288_s29, %s2017_s12 }
  0x32   : > { %p2014_p1 = pnand %p2012_p0, %p2000_p3  ;;  %p2020_p12 = scmp.lt.s32.totalorder %s2018_s22, %s2011_s27 }
  0x34   : > { %p2015_p2 = pneg %p2014_p1  ;;  %p2021_p11 = por %p2020_p12, %p2019_p4 }
  0x36   : > { %p2022_p6 = pnand %p2021_p11, %p2015_p2 }
  0x38   : > { %2025 = shalt.err (!%p2022_p6)
}
  0x39   : > { %1917 = dma.hbm_to_vmem [thread:$0]  (!%p2284_p13), %s2280_s19, 128, %s2288_s29, %s419_s15  }
  0x3a   : > { %p2636_p9 = scmp.lt.s32.totalorder %s2120_s16, 3  ;;  %p2637_p7 = scmp.ge.s32.totalorder %s2120_s16, 1 }
  0x3c   : > { %p435_p0 = pnand %p2637_p7, %p2636_p9 }
  0x3d   : > { %s2315_s26 = sand.u32 (!%p435_p0), 1, %s2112_s30   ;;  %p2638_p6 = scmp.ne.s32.totalorder (!%p435_p0), %s2630_s24, 0 }
  0x3e   : > { %438 = sbr.rel (%p435_p0) target bundleno = 2460 (0x99c), region = 72  ;;  %s2619_s12 = sshll.u32 (!%p435_p0), %s2315_s26, 3 }
  0x3f   : > { %s441_s28 = scalar_lea.sflag (!%p435_p0), [#allocation4], %s2315_s26  ;;  %s444_s13 = scalar_lea.vmem (!%p435_p0), [#allocation3], %s2619_s12 }
  0x43   : > { %2095 = dma.done.wait (%p2638_p6), %s441_s28, 128  }
  0x44   : > { %2097 = vsyncadd (%p2638_p6), %s441_s28, 4294967168  ;;  %vm497_vm0 = vcmask 261120   ;;  %v2325_v0 = vld [vmem:[%s444_s13] sm:$0xff]  ;;  %v529_v7 = vld [vmem:[%s2599_s3 + $0x18] sm:$0xff]  ;;  %v2123_v8 = vmov 0.0   ;;  %vm2124_vm1 = vmmov 0  }
  0x45   : > { %v498_v1 = vsel %vm497_vm0, %v2325_v0, 0.0  ;;  %1816 = vmatprep.subr.mxu1 %v2123_v8  ;;  %v528_v9 = vld [vmem:[%s2599_s3 + $0x10] sm:$0xff]  ;;  %1824 = vmatprep.mubr.msk.f32.mxu1 %vm2124_vm1, %v2123_v8  ;;  %v527_v10 = vld [vmem:[%s2599_s3 + $0x8] sm:$0xff]  ;;  %v526_v11 = vld [vmem:[%s2599_s3] sm:$0xff]  ;;  %s2639_s1 = sld [smem:[#allocation18_spill]]  ;;  %s2125_s19 = smov 120  }
  0x46   : > { %499 = vadd.xlane.f32.xlu0 %v498_v1  ;;  %1817 = vmatpush3.msra.mxu1 %v529_v7  ;;  %s2640_s2 = sld [smem:[#allocation19_spill]]  ;;  %v1743_v21 = vld [vmem:[%s2600_s4] ss:$0 sm:$0xff]  ;;  %s2126_s24 = smov 96   ;;  %vm613_vm2 = vcmask 64512   ;;  %vm950_vm3 = vcmask 130112  }
  0x47   : > { %1837 = vmatprep.subr.mxu0 %v2123_v8  ;;  %1818 = vmatprep.subr.mxu1 %v2123_v8  ;;  %s2127_s23 = smov 88   ;;  %s2128_s20 = smov 80   ;;  %vm1124_vm4 = vcmask 195712   ;;  %vm1298_vm5 = vcmask 261312   ;;  %vm1519_vm6 = vcmask 523264  }
  0x48   : > { %1839 = vmatprep.mubr.msk.f32.mxu0 %vm2124_vm1, %v2123_v8  ;;  %1819 = vmatpush3.msra.mxu1 %v528_v9  ;;  %s2129_s21 = smov 112   ;;  %s2130_s27 = smov 72  }
  0x49   : > { %1820 = vmatprep.subr.mxu1 %v2123_v8  ;;  %s2131_s18 = smov 104   ;;  %s2132_s22 = smov 64  }
  0x4a   : > { %1821 = vmatpush3.msra.mxu1 %v527_v10  ;;  %s2133_s28 = smov 48   ;;  %s2134_s13 = smov 40  }
  0x4b   : > { %1822 = vmatprep.subr.mxu1 %v2123_v8  ;;  %v1741_v16 = vld [vmem:[%s2639_s1] ss:$0 sm:$0xff]  ;;  %s2135_s29 = smov 56   ;;  %s1740_s15 = sshll.u32 %s2315_s26, 5 }
  0x4c   : > { %1823 = vmatpush3.msra.mxu1 %v526_v11  ;;  %v1742_v18 = vld [vmem:[%s2640_s2] ss:$0 sm:$0xff]  ;;  %p2641_p12 = scmp.ne.s32.totalorder %s2631_s25, 0 }
  0x4d   : > { %1827 = vmatprep.subr.mxu1 %v2123_v8 }
  0xcf   : > { %v500_v2 = vpop.xlane.xlu0 %499 }
  0xd0   : > { %v502_v3 = vmul.f32 0.03125, %v500_v2 }
  0xd2   : > { %v503_v4 = vsub.f32 %v2325_v0, %v502_v3 }
  0xd4   : > { %v504_v5 = vmul.f32 %v503_v4, %v503_v4 }
  0xd6   : > { %v505_v6 = vsel %vm497_vm0, %v504_v5, 0.0 }
  0xd7   : > { %506 = vadd.xlane.f32.xlu0 %v505_v6 }
 0x160   : > { %v507_v12 = vpop.xlane.xlu0 %506 }
 0x161   : > { %v508_v13 = vmul.f32 0.03125, %v507_v12 }
 0x163   : > { %v509_v14 = vadd.f32 1e-06, %v508_v13 }
 0x165   : > { %1976 = vrsqrt.f32 %v509_v14 }
 0x172   : > { %v1977_v15 = vpop.eup %1976 }
 0x173   : > { %v511_v17 = vmul.f32 %v1977_v15, %v503_v4 }
 0x175   : > { %v518_v19 = vmul.f32 %v1741_v16, %v511_v17 }
 0x177   : > { %v525_v20 = vadd.f32 %v1742_v18, %v518_v19 }
 0x179   : > { %1825 = vmatmul.mubr.msk.f32.vlgmr.msra.gmra.mxu1 %vm497_vm0, %v525_v20 }
 0x17a   : > { %1829 = vmatprep.mubr.msk.f32.mxu1 %vm2124_vm1, %v2123_v8 }
 0x239   : > { %v606_v22 = vpop.f32.mrf.mxu1 }
 0x23a   : > { %v2365_v23 = vadd.f32 %v1743_v21, %v606_v22 }
 0x23b   : > { %v1826_v24 = vpop.f32.mrf.mxu1 }
 0x23c   : > { %778 = vrot.lane.b32.xlu0 %v2365_v23, %s2125_s19  ;;  %611 = vrot.lane.b32.xlu1 %v2365_v23, %s2126_s24  ;;  %s2409_s19 = scalar_lea.vmem [#allocation7], %s1740_s15  ;;  %v1304_v24 = vld [vmem:[%s2601_s5 + $0x18] sm:$0xff]  ;;  %s2138_s15 = smov 24  }
 0x240   : > { %780 = vrot.lane.b32.xlu1 %v2365_v23, %s2127_s23 }
 0x244   : > { %954 = vrot.lane.b32.xlu1 %v2365_v23, %s2128_s20  ;;  %s1775_s20 = sshll.u32 %s2238_s17, 9 }
 0x248   : > { %952 = vrot.lane.b32.xlu1 %v2365_v23, %s2129_s21  ;;  %s1627_s21 = sshll.u32 %s2409_s19, 4  ;;  %s2528_s21 = int_to_ptr.vmem [resolvable:$true] %s1627_s21 }
 0x24c   : > { %1128 = vrot.lane.b32.xlu1 %v2365_v23, %s2130_s27  ;;  %s2136_s27 = smov 8  }
 0x250   : > { %1126 = vrot.lane.b32.xlu1 %v2365_v23, %s2131_s18 }
 0x2ae   : > { %v612_v25 = vpop.permute.xlu1 %611  ;;  %v779_v27 = vpop.permute.xlu0 %778 }
 0x2af   : > { %1828 = vmatpush3.xpose.msk.msra.mxu1 %vm613_vm2, %v612_v25  ;;  %v1303_v25 = vld [vmem:[%s2601_s5 + $0x10] sm:$0xff] }
 0x2b0   : > { %1832 = vmatprep.subr.mxu1 %v2123_v8 }
 0x2b2   : > { %1830 = vmatmul.mubr.msk.f32.vlgmr.msra.gmra.mxu1 %vm613_vm2, %v2365_v23  ;;  %v781_v26 = vpop.permute.xlu1 %780 }
 0x2b3   : > { %1838 = vmatpush3.xpose.msk.msra.mxu0 %vm613_vm2, %v781_v26  ;;  %1834 = vmatprep.mubr.msk.f32.mxu1 %vm2124_vm1, %v2123_v8 }
 0x2b4   : > { %1847 = vmatprep.subr.mxu0 %v2123_v8 }
 0x2b6   : > { %1840 = vmatmul.mubr.msk.f32.vlgmr.msra.gmra.mxu0 %vm613_vm2, %v779_v27  ;;  %v955_v28 = vpop.permute.xlu1 %954  ;;  %v1302_v27 = vld [vmem:[%s2601_s5 + $0x8] sm:$0xff] }
 0x2b7   : > { %1848 = vmatpush3.xpose.msk.msra.mxu0 %vm613_vm2, %v955_v28  ;;  %1849 = vmatprep.mubr.msk.f32.mxu0 %vm2124_vm1, %v2123_v8 }
 0x2b8   : > { %1857 = vmatprep.subr.mxu0 %v2123_v8 }
 0x2ba   : > { %v953_v29 = vpop.permute.xlu1 %952 }
 0x2bb   : > { %1850 = vmatmul.mubr.msk.f32.vlgmr.msra.gmra.mxu0 %vm613_vm2, %v953_v29  ;;  %v1301_v29 = vld [vmem:[%s2601_s5] sm:$0xff] }
 0x2bc   : > { %1859 = vmatprep.mubr.msk.f32.mxu0 %vm2124_vm1, %v2123_v8 }
 0x2be   : > { %v1129_v30 = vpop.permute.xlu1 %1128 }
 0x2bf   : > { %1858 = vmatpush3.xpose.msk.msra.mxu0 %vm613_vm2, %v1129_v30 }
 0x2c0   : > { %1867 = vmatprep.subr.mxu0 %v2123_v8 }
 0x2c2   : > { %v1127_v31 = vpop.permute.xlu1 %1126 }
 0x2c3   : > { %1860 = vmatmul.mubr.msk.f32.vlgmr.msra.gmra.mxu0 %vm613_vm2, %v1127_v31 }
 0x2c4   : > { %1875 = vmatprep.mubr.msk.f32.mxu0 %vm2124_vm1, %v2123_v8  ;;  %1868 = vmatpush3.msra.mxu0 %v1304_v24 }
 0x2c5   : > { %1869 = vmatprep.subr.mxu0 %v2123_v8 }
 0x2c6   : > { %1870 = vmatpush3.msra.mxu0 %v1303_v25 }
 0x2c7   : > { %1871 = vmatprep.subr.mxu0 %v2123_v8 }
 0x2c8   : > { %1872 = vmatpush3.msra.mxu0 %v1302_v27 }
 0x2c9   : > { %1873 = vmatprep.subr.mxu0 %v2123_v8 }
 0x2ca   : > { %1874 = vmatpush3.msra.mxu0 %v1301_v29 }
 0x2cb   : > { %1889 = vmatprep.subr.mxu0 %v2123_v8 }
 0x372   : > { %v684_v32 = vpop.f32.mrf.mxu1 }
 0x373   : > { %v688_v33 = vmul.f32 0.35355338, %v684_v32 }
 0x374   : > { %v1831_v34 = vpop.f32.mrf.mxu1 }
 0x375   : > { %v689_v35 = vsel %vm613_vm2, %v688_v33, -inf }
 0x376   : > { %v852_v36 = vpop.f32.mrf.mxu0  ;;  %690 = vmax.xlane.f32.xlu1 %v689_v35 }
 0x377   : > { %v856_v37 = vmul.f32 0.35355338, %v852_v36 }
 0x378   : > { %v1841_v38 = vpop.f32.mrf.mxu0 }
 0x379   : > { %v857_v39 = vsel %vm613_vm2, %v856_v37, -inf  ;;  %v1760_v38 = vld [vmem:[%s2602_s6] ss:$0 sm:$0xff] }
 0x37a   : > { %858 = vmax.xlane.f32.xlu0 %v857_v39 }
 0x37b   : > { %v1026_v40 = vpop.f32.mrf.mxu0 }
 0x37c   : > { %v1030_v41 = vmul.f32 0.35355338, %v1026_v40 }
 0x37d   : > { %v1851_v42 = vpop.f32.mrf.mxu0 }
 0x37e   : > { %v1031_v43 = vsel %vm613_vm2, %v1030_v41, -inf }
 0x37f   : > { %1032 = vmax.xlane.f32.xlu1 %v1031_v43 }
 0x383   : > { %v1200_v44 = vpop.f32.mrf.mxu0 }
 0x384   : > { %v1204_v45 = vmul.f32 0.35355338, %v1200_v44 }
 0x385   : > { %v1861_v46 = vpop.f32.mrf.mxu0 }
 0x386   : > { %v1205_v47 = vsel %vm613_vm2, %v1204_v45, -inf }
 0x387   : > { %1206 = vmax.xlane.f32.xlu0 %v1205_v47 }
 0x390   : > { %701 = vrot.lane.b32.xlu1 %v2365_v23, %s2132_s22 }
 0x3ff   : > { %v691_v48 = vpop.xlane.xlu1 %690 }
 0x400   : > { %v692_v49 = vsub.f32 %v688_v33, %v691_v48 }
 0x402   : > { %v693_v50 = vmul.f32 1.442695, %v692_v49  ;;  %v1418_v49 = vld [vmem:[%s2605_s9 + $0x18] sm:$0xff] }
 0x403   : > { %v859_v51 = vpop.xlane.xlu0 %858 }
 0x404   : > { %1978 = vpow2.f32 %v693_v50  ;;  %v860_v52 = vsub.f32 %v856_v37, %v859_v51  ;;  %v1416_v50 = vld [vmem:[%s2605_s9 + $0x8] sm:$0xff]  ;;  %v1415_v51 = vld [vmem:[%s2605_s9] sm:$0xff] }
 0x406   : > { %v861_v53 = vmul.f32 1.442695, %v860_v52 }
 0x408   : > { %1980 = vpow2.f32 %v861_v53  ;;  %v1033_v54 = vpop.xlane.xlu1 %1032 }
 0x409   : > { %v1034_v55 = vsub.f32 %v1030_v41, %v1033_v54 }
 0x40b   : > { %v1035_v56 = vmul.f32 1.442695, %v1034_v55 }
 0x40c   : > { %v702_v57 = vpop.permute.xlu1 %701 }
 0x40d   : > { %1982 = vpow2.f32 %v1035_v56  ;;  %1833 = vmatpush3.msra.mxu1 %v702_v57  ;;  %v1762_v56 = vld [vmem:[%s2603_s7] ss:$0 sm:$0xff] }
 0x40e   : > { %1842 = vmatprep.subr.mxu1 %v2123_v8 }
 0x410   : > { %v1207_v58 = vpop.xlane.xlu0 %1206 }
 0x411   : > { %v1979_v59 = vpop.eup %1978  ;;  %v1208_v60 = vsub.f32 %v1204_v45, %v1207_v58  ;;  %v1763_v58 = vld [vmem:[%s2604_s8] ss:$0 sm:$0xff] }
 0x412   : > { %v695_v61 = vsel %vm613_vm2, %v1979_v59, 0.0 }
 0x413   : > { %v1209_v62 = vmul.f32 1.442695, %v1208_v60  ;;  %696 = vadd.xlane.f32.xlu1 %v695_v61  ;;  %v1511_v61 = vld [vmem:[%s2607_s11 + $0x38] sm:$0xff] }
 0x415   : > { %v1981_v63 = vpop.eup %1980  ;;  %1984 = vpow2.f32 %v1209_v62  ;;  %v1510_v62 = vld [vmem:[%s2607_s11 + $0x30] sm:$0xff] }
 0x416   : > { %v863_v1 = vsel %vm613_vm2, %v1981_v63, 0.0 }
 0x417   : > { %864 = vadd.xlane.f32.xlu0 %v863_v1  ;;  %v1508_v1 = vld [vmem:[%s2607_s11 + $0x20] sm:$0xff] }
 0x41a   : > { %v1983_v2 = vpop.eup %1982 }
 0x41b   : > { %v1037_v3 = vsel %vm613_vm2, %v1983_v2, 0.0 }
 0x41c   : > { %1038 = vadd.xlane.f32.xlu1 %v1037_v3  ;;  %v1506_v3 = vld [vmem:[%s2607_s11 + $0x10] sm:$0xff] }
 0x422   : > { %v1985_v4 = vpop.eup %1984 }
 0x423   : > { %v1211_v5 = vsel %vm613_vm2, %v1985_v4, 0.0 }
 0x424   : > { %1212 = vadd.xlane.f32.xlu0 %v1211_v5  ;;  %v1504_v5 = vld [vmem:[%s2607_s11] sm:$0xff] }
 0x42d   : > { %1044 = vrot.lane.b32.xlu1 %v2365_v23, %s2133_s28  ;;  %s2526_s28 = scalar_lea.hbm %s2610_s14, %s1775_s20 }
 0x431   : > { %1218 = vrot.lane.b32.xlu1 %v2365_v23, %s2134_s13  ;;  %s1601_s13 = scalar_lea.sflag [#allocation8], %s2315_s26 }
 0x43a   : > { %870 = vrot.lane.b32.xlu0 %v2365_v23, %s2135_s29  ;;  %s2137_s29 = smov 16  }
 0x49c   : > { %v697_v6 = vpop.xlane.xlu1 %696 }
 0x49d   : > { %1986 = vrcp.f32 %v697_v6  ;;  %v1764_v6 = vld [vmem:[%s2606_s10] ss:$0 sm:$0xff] }
 0x4a0   : > { %v865_v7 = vpop.xlane.xlu0 %864 }
 0x4a1   : > { %1988 = vrcp.f32 %v865_v7 }
 0x4a5   : > { %v1039_v9 = vpop.xlane.xlu1 %1038 }
 0x4a6   : > { %1990 = vrcp.f32 %v1039_v9 }
 0x4a9   : > { %v1045_v15 = vpop.permute.xlu1 %1044 }
 0x4aa   : > { %v1987_v10 = vpop.eup %1986 }
 0x4ab   : > { %v699_v11 = vmul.f32 %v1987_v10, %v1979_v59 }
 0x4ad   : > { %v1213_v12 = vpop.xlane.xlu0 %1212  ;;  %700 = vst.msk [vmem:[%s2409_s19] sm:$0xff] %vm613_vm2, %v699_v11  ;;  %1835 = vmatmul.mubr.msk.f32.vlgmr.msra.gmra.mxu1 %vm613_vm2, %v699_v11  ;;  %v1219_v19 = vpop.permute.xlu1 %1218 }
 0x4ae   : > { %v1989_v13 = vpop.eup %1988  ;;  %1992 = vrcp.f32 %v1213_v12  ;;  %1844 = vmatprep.mubr.msk.f32.mxu1 %vm2124_vm1, %v2123_v8 }
 0x4af   : > { %v867_v14 = vmul.f32 %v1989_v13, %v1981_v63  ;;  %v1509_v63 = vld [vmem:[%s2607_s11 + $0x28] sm:$0xff] }
 0x4b1   : > { %v871_v16 = vpop.permute.xlu0 %870  ;;  %1750 = vst.msk [vmem:[%s2409_s19 + $0x8] sm:$0xff] %vm613_vm2, %v867_v14 }
 0x4b2   : > { %1843 = vmatpush3.msra.mxu1 %v871_v16 }
 0x4b3   : > { %v1991_v17 = vpop.eup %1990  ;;  %1845 = vmatmul.mubr.msk.f32.vlgmr.msra.gmra.mxu1 %vm613_vm2, %v867_v14  ;;  %1852 = vmatprep.subr.mxu1 %v2123_v8 }
 0x4b4   : > { %1853 = vmatpush3.msra.mxu1 %v1045_v15  ;;  %1854 = vmatprep.mubr.msk.f32.mxu1 %vm2124_vm1, %v2123_v8  ;;  %v1041_v18 = vmul.f32 %v1991_v17, %v1983_v2  ;;  %v1507_v2 = vld [vmem:[%s2607_s11 + $0x18] sm:$0xff] }
 0x4b5   : > { %1862 = vmatprep.subr.mxu1 %v2123_v8 }
 0x4b6   : > { %1754 = vst.msk [vmem:[%s2409_s19 + $0x10] sm:$0xff] %vm613_vm2, %v1041_v18 }
 0x4b7   : > { %1855 = vmatmul.mubr.msk.f32.vlgmr.msra.gmra.mxu1 %vm613_vm2, %v1041_v18 }
 0x4b8   : > { %1863 = vmatpush3.msra.mxu1 %v1219_v19  ;;  %1864 = vmatprep.mubr.msk.f32.mxu1 %vm2124_vm1, %v2123_v8 }
 0x4b9   : > { %1878 = vmatprep.subr.mxu1 %v2123_v8 }
 0x4bb   : > { %v1993_v20 = vpop.eup %1992 }
 0x4bc   : > { %v1215_v21 = vmul.f32 %v1993_v20, %v1985_v4  ;;  %v1505_v4 = vld [vmem:[%s2607_s11 + $0x8] sm:$0xff] }
 0x4be   : > { %1758 = vst.msk [vmem:[%s2409_s19 + $0x18] sm:$0xff] %vm613_vm2, %v1215_v21  ;;  %1865 = vmatmul.mubr.msk.f32.vlgmr.msra.gmra.mxu1 %vm613_vm2, %v1215_v21 }
 0x4bf   : > { %1886 = vmatprep.mubr.msk.f32.mxu1 %vm2124_vm1, %v2123_v8  ;;  %1879 = vmatpush3.msra.mxu1 %v1418_v49 }
 0x4c0   : > { %1880 = vmatprep.subr.mxu1 %v2123_v8 }
 0x56d   : > { %v773_v22 = vpop.f32.mrf.mxu1 }
 0x56e   : > { %777 = vst.msk [vmem:[#allocation2] sm:$0xff] %vm613_vm2, %v773_v22 }
 0x56f   : > { %v1836_v23 = vpop.f32.mrf.mxu1 }
 0x573   : > { %v942_v26 = vpop.f32.mrf.mxu1 }
 0x574   : > { %947 = vrot.lane.b32.xlu0 %v942_v26, %s2136_s27 }
 0x575   : > { %v1846_v28 = vpop.f32.mrf.mxu1 }
 0x577   : > { %v1116_v30 = vpop.f32.mrf.mxu1 }
 0x578   : > { %1121 = vrot.lane.b32.xlu1 %v1116_v30, %s2137_s29  ;;  %s2026_s29 = scalar_lea.vmem %s2528_s21, 512 }
 0x579   : > { %v1856_v31 = vpop.f32.mrf.mxu1  ;;  %p2027_p11 = scmp.ne.s32.totalorder %s2528_s21, %s2026_s29 }
 0x57b   : > { %p2028_p13 = pnand %p2027_p11, %p2641_p12 }
 0x57d   : > { %p2029_p1 = pneg %p2028_p13 }
 0x57e   : > { %v1290_v32 = vpop.f32.mrf.mxu1 }
 0x57f   : > { %1295 = vrot.lane.b32.xlu0 %v1290_v32, %s2138_s15  ;;  %s2139_s15 = smov [#allocation7]  }
 0x580   : > { %v1866_v33 = vpop.f32.mrf.mxu1  ;;  %s2030_s24 = sshll.u32 %s2139_s15, 4  ;;  %s2031_s24 = int_to_ptr.vmem [resolvable:$false] %s2030_s24 }
 0x581   : > { %s2032_s19 = scalar_lea.vmem %s2031_s24, 1024  ;;  %p2033_p3 = scmp.lt.s32.totalorder %s2528_s21, %s2031_s24 }
 0x582   : > { %p2034_p5 = scmp.lt.s32.totalorder %s2032_s19, %s2026_s29 }
 0x584   : > { %p2035_p8 = por %p2034_p5, %p2033_p3 }
 0x586   : > { %p2036_p10 = pnand %p2035_p8, %p2029_p1 }
 0x5e6   : > { %v948_v34 = vpop.permute.xlu0 %947 }
 0x5e7   : > { %951 = vst.msk [vmem:[#allocation2] sm:$0xff] %vm950_vm3, %v948_v34 }
 0x5ea   : > { %v1122_v35 = vpop.permute.xlu1 %1121 }
 0x5eb   : > { %1125 = vst.msk [vmem:[#allocation2] sm:$0xff] %vm1124_vm4, %v1122_v35 }
 0x5f1   : > { %v1296_v36 = vpop.permute.xlu0 %1295 }
 0x5f2   : > { %1299 = vst.msk [vmem:[#allocation2] sm:$0xff] %vm1298_vm5, %v1296_v36 }
 0x5f9   : > { %v1300_v37 = vld [vmem:[#allocation2] sm:$0xff] }
 0x5fa   : > { %1876 = vmatmul.mubr.msk.f32.vlgmr.msra.gmra.mxu0 %vm497_vm0, %v1300_v37 }
 0x5fb   : > { %1905 = vmatprep.mubr.msk.f32.mxu0 %vm2124_vm1, %v2123_v8  ;;  %1890 = vmatpush3.msra.mxu0 %v1511_v61 }
 0x5fc   : > { %1891 = vmatprep.subr.mxu0 %v2123_v8 }
 0x5fd   : > { %1892 = vmatpush3.msra.mxu0 %v1510_v62 }
 0x5fe   : > { %1893 = vmatprep.subr.mxu0 %v2123_v8 }
 0x5ff   : > { %1894 = vmatpush3.msra.mxu0 %v1509_v63 }
 0x600   : > { %1895 = vmatprep.subr.mxu0 %v2123_v8 }
 0x601   : > { %1896 = vmatpush3.msra.mxu0 %v1508_v1 }
 0x602   : > { %1897 = vmatprep.subr.mxu0 %v2123_v8 }
 0x603   : > { %1898 = vmatpush3.msra.mxu0 %v1507_v2 }
 0x604   : > { %1899 = vmatprep.subr.mxu0 %v2123_v8 }
 0x605   : > { %1900 = vmatpush3.msra.mxu0 %v1506_v3 }
 0x606   : > { %1901 = vmatprep.subr.mxu0 %v2123_v8 }
 0x607   : > { %1902 = vmatpush3.msra.mxu0 %v1505_v4 }
 0x608   : > { %1903 = vmatprep.subr.mxu0 %v2123_v8 }
 0x609   : > { %1904 = vmatpush3.msra.mxu0 %v1504_v5 }
 0x6ba   : > { %v1381_v39 = vpop.f32.mrf.mxu0 }
 0x6bb   : > { %v1382_v40 = vadd.f32 %v1760_v38, %v1381_v39 }
 0x6bc   : > { %v1877_v41 = vpop.f32.mrf.mxu0 }
 0x6bd   : > { %v2459_v42 = vadd.f32 %v1382_v40, %v2325_v0  ;;  %v1417_v0 = vld [vmem:[%s2605_s9 + $0x10] sm:$0xff] }
 0x6be   : > { %1881 = vmatpush3.msra.mxu1 %v1417_v0 }
 0x6bf   : > { %v1388_v43 = vsel %vm497_vm0, %v2459_v42, 0.0  ;;  %1882 = vmatprep.subr.mxu1 %v2123_v8 }
 0x6c0   : > { %1389 = vadd.xlane.f32.xlu1 %v1388_v43  ;;  %1883 = vmatpush3.msra.mxu1 %v1416_v50 }
 0x6c1   : > { %1884 = vmatprep.subr.mxu1 %v2123_v8 }
 0x6c2   : > { %1885 = vmatpush3.msra.mxu1 %v1415_v51 }
 0x749   : > { %v1390_v44 = vpop.xlane.xlu1 %1389 }
 0x74a   : > { %v1391_v45 = vmul.f32 0.03125, %v1390_v44 }
 0x74c   : > { %v1392_v46 = vsub.f32 %v2459_v42, %v1391_v45 }
 0x74e   : > { %v1393_v47 = vmul.f32 %v1392_v46, %v1392_v46 }
 0x750   : > { %v1394_v48 = vsel %vm497_vm0, %v1393_v47, 0.0 }
 0x751   : > { %1395 = vadd.xlane.f32.xlu0 %v1394_v48 }
 0x7da   : > { %v1396_v52 = vpop.xlane.xlu0 %1395 }
 0x7db   : > { %v1397_v53 = vmul.f32 0.03125, %v1396_v52 }
 0x7dd   : > { %v1398_v54 = vadd.f32 1e-06, %v1397_v53 }
 0x7df   : > { %1994 = vrsqrt.f32 %v1398_v54 }
 0x7ec   : > { %v1995_v55 = vpop.eup %1994 }
 0x7ed   : > { %v1400_v57 = vmul.f32 %v1995_v55, %v1392_v46 }
 0x7ef   : > { %v1407_v59 = vmul.f32 %v1762_v56, %v1400_v57 }
 0x7f1   : > { %v1414_v60 = vadd.f32 %v1763_v58, %v1407_v59 }
 0x7f3   : > { %1887 = vmatmul.mubr.msk.f32.vlgmr.msra.gmra.mxu1 %vm497_vm0, %v1414_v60 }
 0x8b3   : > { %v1495_v7 = vpop.f32.mrf.mxu1 }
 0x8b4   : > { %v1496_v9 = vadd.f32 %v1764_v6, %v1495_v7 }
 0x8b5   : > { %v1888_v10 = vpop.f32.mrf.mxu1 }
 0x8b6   : > { %v1500_v11 = vmul.f32 0.70710677, %v1496_v9  ;;  %v1499_v13 = vmul.f32 0.5, %v1496_v9 }
 0x8b8   : > { %1996 = verf.f32 %v1500_v11 }
 0x8c5   : > { %v1997_v12 = vpop.eup %1996 }
 0x8c6   : > { %v1502_v14 = vadd.f32 1.0, %v1997_v12 }
 0x8c8   : > { %v1503_v15 = vmul.f32 %v1502_v14, %v1499_v13 }
 0x8ca   : > { %1906 = vmatmul.mubr.msk.f32.vlgmr.msra.gmra.mxu0 %vm1519_vm6, %v1503_v15 }
 0x8cb   : > { %2039 = shalt.err (!%p2036_p10)
}
 0x8cc   : > { %s2040_s23 = scalar_lea.hbm %s2526_s28, 512  ;;  %s2044_s22 = scalar_lea.hbm %s2610_s14, 1024 }
 0x8cd   : > { %p2041_p2 = scmp.ne.s32.totalorder %s2526_s28, %s2040_s23  ;;  %p2045_p7 = scmp.lt.s32.totalorder %s2526_s28, %s2610_s14 }
 0x8ce   : > { %p2046_p0 = scmp.lt.s32.totalorder %s2044_s22, %s2040_s23 }
 0x8cf   : > { %p2042_p4 = pnand %p2041_p2, %p2641_p12 }
 0x8d0   : > { %p2047_p6 = por %p2046_p0, %p2045_p7 }
 0x8d1   : > { %p2043_p9 = pneg %p2042_p4 }
 0x8d3   : > { %p2048_p11 = pnand %p2047_p6, %p2043_p9 }
 0x8d5   : > { %2051 = shalt.err (!%p2048_p11)
}
 0x8d6   : > { %s2140_s29 = smov 128   ;;  %s2642_s19 = sld [smem:[#allocation20_spill]] }
 0x8d7   : > { %1911 = dma.vmem_to_hbm [thread:$0]  (%p2641_p12), %s2528_s21, 512, %s2526_s28, %s1601_s13, %s2140_s29, %s2140_s29, %s2136_s27  }
 0x8d8   : > { %s1770_s23 = sshll.u32 %s2238_s17, 7  ;;  %s2643_s20 = sshll.u32 %s2315_s26, 3 }
 0x8d9   : > { %s486_s18 = scalar_lea.vmem [#allocation6], %s2643_s20  ;;  %s2644_s1 = sld [smem:[#allocation21_spill]] }
 0x8da   : > { %s1614_s22 = sshll.u32 %s486_s18, 4  ;;  %s1596_s27 = scalar_lea.sflag [#allocation5], %s2315_s26  ;;  %s1615_s22 = int_to_ptr.vmem [resolvable:$true] %s1614_s22 }
 0x8db   : > { %s2052_s21 = scalar_lea.vmem %s1615_s22, 128  ;;  %s2141_s17 = smov [#allocation6]  }
 0x8dc   : > { %v1766_v8 = vld [vmem:[%s2642_s19] ss:$0 sm:$0xff]  ;;  %p2053_p13 = scmp.ne.s32.totalorder %s1615_s22, %s2052_s21  ;;  %s2056_s28 = sshll.u32 %s2141_s17, 4  ;;  %s2057_s28 = int_to_ptr.vmem [resolvable:$false] %s2056_s28 }
 0x8dd   : > { %s2058_s13 = scalar_lea.vmem %s2057_s28, 256  ;;  %p2059_p5 = scmp.lt.s32.totalorder %s1615_s22, %s2057_s28 }
 0x8de   : > { %p2054_p1 = pnand %p2053_p13, %p2641_p12  ;;  %p2060_p8 = scmp.lt.s32.totalorder %s2058_s13, %s2052_s21 }
 0x8df   : > { %s1612_s2 = scalar_lea.hbm %s2644_s1, %s1770_s23 }
 0x8e0   : > { %p2055_p3 = pneg %p2054_p1  ;;  %p2061_p10 = por %p2060_p8, %p2059_p5 }
 0x8e2   : > { %p2062_p2 = pnand %p2061_p10, %p2055_p3 }
 0x98a   : > { %v1589_v16 = vpop.f32.mrf.mxu0 }
 0x98b   : > { %v1590_v17 = vadd.f32 %v1766_v8, %v1589_v16 }
 0x98c   : > { %v1907_v18 = vpop.f32.mrf.mxu0 }
 0x98d   : > { %v1593_v19 = vadd.f32 %v1590_v17, %v2459_v42 }
 0x98f   : > { %1594 = vst.msk [vmem:[%s486_s18] sm:$0xff] %vm497_vm0, %v1593_v19 }
 0x990   : > { %2065 = shalt.err (!%p2062_p2)
}
 0x991   : > { %s2066_s0 = scalar_lea.hbm %s1612_s2, 128  ;;  %s2070_s24 = scalar_lea.hbm %s2644_s1, 256 }
 0x992   : > { %p2067_p4 = scmp.ne.s32.totalorder %s1612_s2, %s2066_s0  ;;  %p2071_p0 = scmp.lt.s32.totalorder %s1612_s2, %s2644_s1 }
 0x993   : > { %p2072_p6 = scmp.lt.s32.totalorder %s2070_s24, %s2066_s0 }
 0x994   : > { %p2068_p9 = pnand %p2067_p4, %p2641_p12 }
 0x995   : > { %p2073_p11 = por %p2072_p6, %p2071_p0 }
 0x996   : > { %p2069_p7 = pneg %p2068_p9 }
 0x998   : > { %p2074_p13 = pnand %p2073_p11, %p2069_p7 }
 0x99a   : > { %2077 = shalt.err (!%p2074_p13)
}
 0x99b   : > { %1910 = dma.vmem_to_hbm [thread:$0]  (%p2641_p12), %s1615_s22, 128, %s1612_s2, %s1596_s27  }
 0x99c PF: > { %s2645_s23 = sld [smem:[#allocation12_spill]]  ;;  %p2648_p3 = scmp.ge.s32.totalorder %s2120_s16, 2 }
 0x99d   : > { %s2646_s20 = sld [smem:[#allocation16_spill]] }
 0x9a2   : > { %s1642_s18 = sand.u32 1, %s2645_s23  }
 0x9a3   : > { %p2647_p1 = scmp.ne.s32.totalorder %s2646_s20, 0  ;;  %s1643_s15 = scalar_lea.sflag [#allocation5], %s1642_s18 }
 0x9a5   : > { %p1919_p5 = pnand %p2648_p3, %p2647_p1 }
 0x9a7   : > { %p1920_p8 = pneg %p1919_p5 }
 0x9a9   : > { %2099 = dma.done.wait (%p1920_p8), %s1643_s15, 128  }
 0x9aa   : > { %2101 = vsyncadd (%p1920_p8), %s1643_s15, 4294967168  ;;  %s1652_s21 = scalar_lea.sflag [#allocation8], %s1642_s18 }
 0x9ab   : > { %2103 = dma.done.wait (%p1920_p8), %s1652_s21, 512  }
 0x9ac   : > { %2105 = vsyncadd (%p1920_p8), %s1652_s21, 4294966784  ;;  %s2649_s16 = sld [smem:[#allocation14_spill]]  ;;  %s2652_s29 = smov %s2112_s30 }
 0x9ad   : > { %s2650_s17 = sld [smem:[#allocation13_spill]] }
 0x9ae   : > { %s2651_s15 = sld [smem:[#allocation15_spill]] }
 0x9b2   : > { %p31_p12 = scmp.ge.s32.totalorder %s2649_s16, 4  }
 0x9b3   : > { %s2653_s30 = smov %s2650_s17 }
 0x9b4   :  { %33 = sbr.rel (!%p31_p12) target bundleno = 13 (0xd), region = 137 }
 0x9b9   :  { %1657 = vsyncpa [#allocation4], 1 }
 0x9ba   :  { %1659 = vsyncpa [#allocation4 + $0x1], 1 }
 0x9bb   :  { %1660 = vsyncpa [#allocation5], 1 }
 0x9bc   :  { %1662 = vsyncpa [#allocation5 + $0x1], 1 }
 0x9bd   :  { %1663 = vsyncpa [#allocation8], 1 }
 0x9be   :  { %1665 = vsyncpa [#allocation8 + $0x1], 1 }

</bundles_post_ra>
